<compile_context>
chip_gen: v7x
topology: tpu7x:2x2x1
jax: 0.10.0
libtpu: 0.0.40
codegen_flags: <defaults>
</compile_context>

<pallas_src>
import functools
import math

import jax
import jax.numpy as jnp
from jax.experimental import pallas as pl
from jax.experimental.pallas import tpu as pltpu


def _encoder_layer_kernel(h, eps,
                          x_ref, mask_ref,
                          wqkv_ref, bqkv_ref, wo_ref, bo_ref,
                          ln1_g_ref, ln1_b_ref,
                          w1_ref, b1_ref, w2_ref, b2_ref,
                          ln2_g_ref, ln2_b_ref,
                          out_ref):
    bf16 = jnp.bfloat16
    f32 = jnp.float32

    x = x_ref[0].astype(f32)                   # (S, D) residual, kept in registers
    S, D = x.shape
    dh = D // h
    scale = 1.0 / math.sqrt(dh)                # python float -> literal constant

    # --- fused QKV projection: one wide (S,D)x(D,3D) MXU matmul, f32 accum ---
    qkv = jnp.dot(x.astype(bf16), wqkv_ref[...].astype(bf16),
                  preferred_element_type=f32) + bqkv_ref[...]          # (S, 3D)

    # --- head-batched attention: (h, S, dh) operands ---
    def heads(t):                               # (S, D) -> (h, S, dh)
        return jnp.swapaxes(t.reshape(S, h, dh), 0, 1)

    q = heads(qkv[:, 0 * D:1 * D]).astype(bf16)
    k = heads(qkv[:, 1 * D:2 * D]).astype(bf16)
    v = heads(qkv[:, 2 * D:3 * D]).astype(bf16)

    s = jnp.einsum('hqd,hkd->hqk', q, k,
                   preferred_element_type=f32) * scale                 # (h, S, S)

    key_valid = mask_ref[0]                     # (1, S) key-padding mask
    s = jnp.where(key_valid[None, :, :] > 0, s, -1e9)

    # softmax in f32; normalization via the (nearly free) EUP approx reciprocal
    m = jnp.max(s, axis=-1, keepdims=True)
    p = jnp.exp(s - m)
    p = p * pl.reciprocal(jnp.sum(p, axis=-1, keepdims=True), approx=True)

    ctx = jnp.einsum('hqk,hkd->hqd', p.astype(bf16), v,
                     preferred_element_type=f32)                       # (h, S, dh)

    # reassemble heads in registers (no VMEM scratch) and use a wide K=D matmul
    ctx = jnp.swapaxes(ctx, 0, 1).reshape(S, D)
    attn_out = jnp.dot(ctx.astype(bf16), wo_ref[...].astype(bf16),
                       preferred_element_type=f32) + bo_ref[...]

    # --- residual + LayerNorm 1 (dropout == identity in eval mode) ---
    y = attn_out + x
    mu = jnp.mean(y, axis=-1, keepdims=True)
    var = jnp.mean(jnp.square(y - mu), axis=-1, keepdims=True)
    y = (y - mu) * jax.lax.rsqrt(var + eps) * ln1_g_ref[...] + ln1_b_ref[...]

    # --- position-wise feed forward: D -> d_ff -> D with ReLU ---
    hdd = jnp.dot(y.astype(bf16), w1_ref[...].astype(bf16),
                  preferred_element_type=f32) + b1_ref[...]
    hdd = jnp.maximum(hdd, 0.0)
    f = jnp.dot(hdd.astype(bf16), w2_ref[...].astype(bf16),
                preferred_element_type=f32) + b2_ref[...]

    # --- residual + LayerNorm 2 ---
    z = f + y
    mu2 = jnp.mean(z, axis=-1, keepdims=True)
    var2 = jnp.mean(jnp.square(z - mu2), axis=-1, keepdims=True)
    z = (z - mu2) * jax.lax.rsqrt(var2 + eps) * ln2_g_ref[...] + ln2_b_ref[...]

    out_ref[0] = z.astype(out_ref.dtype)


def encoder_layer(x, key_mask, params, *, h, eps=1e-6):
    """x: (B, S, D); key_mask: (B, S) with 1.0 = attend, 0.0 = masked."""
    B, S, D = x.shape
    d_ff = params["w1"].shape[1]
    dh = D // h

    # Pack QKV weights/biases once in the wrapper (single XLA concat, reused
    # every call under jit) so the kernel does one wide projection matmul.
    wqkv = jnp.concatenate([params["wq"], params["wk"], params["wv"]], axis=1)   # (D, 3D)
    bqkv = jnp.concatenate([params["bq"], params["bk"], params["bv"]], axis=1)   # (1, 3D)
    mask3 = key_mask.reshape(B, 1, S).astype(jnp.float32)

    weights = [
        wqkv, bqkv, params["wo"], params["bo"],
        params["ln1_g"], params["ln1_b"],
        params["w1"], params["b1"], params["w2"], params["b2"],
        params["ln2_g"], params["ln2_b"],
    ]
    # All weights are 2-D; constant index_map -> same block every grid step
    # (Pallas does not re-fetch an unchanged block between iterations).
    weight_specs = [pl.BlockSpec(w.shape, lambda b: (0, 0)) for w in weights]

    kernel = functools.partial(_encoder_layer_kernel, h, float(eps))

    # Advisory cost estimate so XLA can overlap neighboring ops with this call.
    itemsize = jnp.dtype(x.dtype).itemsize
    flops = int(
        B * (2 * S * D * 3 * D          # fused QKV projection
             + 2 * h * S * S * dh * 2   # scores + p@v
             + 2 * S * D * D            # output projection
             + 2 * S * D * d_ff * 2))   # FFN up + down
    transcendentals = int(B * h * S * S + 4 * B * S)
    bytes_accessed = int(
        x.size * itemsize + mask3.size * 4 + x.size * itemsize
        + sum(int(w.size) * jnp.dtype(w.dtype).itemsize for w in weights))

    return pl.pallas_call(
        kernel,
        out_shape=jax.ShapeDtypeStruct((B, S, D), x.dtype),
        grid_spec=pltpu.PrefetchScalarGridSpec(
            num_scalar_prefetch=0,
            grid=(B,),
            in_specs=[pl.BlockSpec((1, S, D), lambda b: (b, 0, 0)),
                      pl.BlockSpec((1, 1, S), lambda b: (b, 0, 0))] + weight_specs,
            out_specs=pl.BlockSpec((1, S, D), lambda b: (b, 0, 0)),
        ),
        compiler_params=pltpu.CompilerParams(dimension_semantics=("parallel",)),
        cost_estimate=pl.CostEstimate(flops=flops,
                                      transcendentals=transcendentals,
                                      bytes_accessed=bytes_accessed),
    )(x, mask3, *weights)


def encoder_layer_ref(x, key_mask, prm, *, h, eps=1e-6):
    """Pure-JAX reference using the same bf16-operand / f32-accumulate precision."""
    bf16, f32 = jnp.bfloat16, jnp.float32
    B, S, D = x.shape
    dh = D // h
    xf = x.astype(f32)

    def proj(w, b):
        return jnp.einsum('bsd,df->bsf', xf.astype(bf16), w.astype(bf16),
                          preferred_element_type=f32) + b

    q = proj(prm["wq"], prm["bq"]).reshape(B, S, h, dh).transpose(0, 2, 1, 3)
    k = proj(prm["wk"], prm["bk"]).reshape(B, S, h, dh).transpose(0, 2, 1, 3)
    v = proj(prm["wv"], prm["bv"]).reshape(B, S, h, dh).transpose(0, 2, 1, 3)

    s = jnp.einsum('bhqd,bhkd->bhqk', q.astype(bf16), k.astype(bf16),
                   preferred_element_type=f32) / math.sqrt(dh)
    s = jnp.where(key_mask[:, None, None, :] > 0, s, -1e9)
    pa = jax.nn.softmax(s, axis=-1)
    ctx = jnp.einsum('bhqk,bhkd->bhqd', pa.astype(bf16), v.astype(bf16),
                     preferred_element_type=f32)
    ctx = ctx.transpose(0, 2, 1, 3).reshape(B, S, D)
    attn = jnp.einsum('bsd,df->bsf', ctx.astype(bf16), prm["wo"].astype(bf16),
                      preferred_element_type=f32) + prm["bo"]

    def ln(t, g, b):
        mu = jnp.mean(t, -1, keepdims=True)
        var = jnp.mean(jnp.square(t - mu), -1, keepdims=True)
        return (t - mu) * jax.lax.rsqrt(var + eps) * g + b

    y = ln(attn + xf, prm["ln1_g"], prm["ln1_b"])
    hdd = jnp.maximum(
        jnp.einsum('bsd,df->bsf', y.astype(bf16), prm["w1"].astype(bf16),
                   preferred_element_type=f32) + prm["b1"], 0.0)
    f = jnp.einsum('bsf,fd->bsd', hdd.astype(bf16), prm["w2"].astype(bf16),
                   preferred_element_type=f32) + prm["b2"]
    return ln(f + y, prm["ln2_g"], prm["ln2_b"]).astype(x.dtype)


def init_params(key, d_model, d_ff):
    ks = jax.random.split(key, 6)

    def lin(k, fan_in, fan_out):
        scale = 1.0 / math.sqrt(fan_in)
        return jax.random.uniform(k, (fan_in, fan_out), jnp.float32, -scale, scale)

    return {
        "wq": lin(ks[0], d_model, d_model), "bq": jnp.zeros((1, d_model), jnp.float32),
        "wk": lin(ks[1], d_model, d_model), "bk": jnp.zeros((1, d_model), jnp.float32),
        "wv": lin(ks[2], d_model, d_model), "bv": jnp.zeros((1, d_model), jnp.float32),
        "wo": lin(ks[3], d_model, d_model), "bo": jnp.zeros((1, d_model), jnp.float32),
        "ln1_g": jnp.ones((1, d_model), jnp.float32),
        "ln1_b": jnp.zeros((1, d_model), jnp.float32),
        "w1": lin(ks[4], d_model, d_ff), "b1": jnp.zeros((1, d_ff), jnp.float32),
        "w2": lin(ks[5], d_ff, d_model), "b2": jnp.zeros((1, d_model), jnp.float32),
        "ln2_g": jnp.ones((1, d_model), jnp.float32),
        "ln2_b": jnp.zeros((1, d_model), jnp.float32),
    }


if __name__ == "__main__":
    B, S, d_model, d_ff, h = 2, 16, 128, 256, 4

    key = jax.random.PRNGKey(0)
    kx, kp = jax.random.split(key)
    x = jax.random.normal(kx, (B, S, d_model), jnp.float32)

    # key-padding mask: sequence 0 has 16 valid tokens, sequence 1 has 11.
    lengths = jnp.array([16, 11], jnp.int32)
    key_mask = (jnp.arange(S)[None, :] < lengths[:, None]).astype(jnp.float32)  # (B, S)

    params = init_params(kp, d_model, d_ff)

    out = encoder_layer(x, key_mask, params, h=h)
    out = jax.block_until_ready(out)

    ref = encoder_layer_ref(x, key_mask, params, h=h)
    assert out.shape == (B, S, d_model)
    max_err = float(jnp.max(jnp.abs(out - ref)))
    assert jnp.allclose(out, ref, atol=2e-2, rtol=2e-2), max_err

    print("KERNEL_OK")
</pallas_src>

<mosaic_0001>
module attributes {stable_mosaic.version = 11 : i64} {
  func.func @_encoder_layer_kernel(%arg0: i32, %arg1: memref<1x16x128xf32, #tpu.memory_space<vmem>>, %arg2: memref<1x1x16xf32, #tpu.memory_space<vmem>>, %arg3: memref<128x384xf32, #tpu.memory_space<vmem>>, %arg4: memref<1x384xf32, #tpu.memory_space<vmem>>, %arg5: memref<128x128xf32, #tpu.memory_space<vmem>>, %arg6: memref<1x128xf32, #tpu.memory_space<vmem>>, %arg7: memref<1x128xf32, #tpu.memory_space<vmem>>, %arg8: memref<1x128xf32, #tpu.memory_space<vmem>>, %arg9: memref<128x256xf32, #tpu.memory_space<vmem>>, %arg10: memref<1x256xf32, #tpu.memory_space<vmem>>, %arg11: memref<256x128xf32, #tpu.memory_space<vmem>>, %arg12: memref<1x128xf32, #tpu.memory_space<vmem>>, %arg13: memref<1x128xf32, #tpu.memory_space<vmem>>, %arg14: memref<1x128xf32, #tpu.memory_space<vmem>>, %arg15: memref<1x16x128xf32, #tpu.memory_space<vmem>>) attributes {dimension_semantics = [#tpu.dimension_semantics<parallel>], iteration_bounds = array<i64: 2>, scalar_prefetch = 0 : i64, scratch_operands = 0 : i64, tpu.core_type = #tpu.core_type<tc>, window_params = [{transform_indices = @transform_0, window_bounds = array<i64: 1, 16, 128>}, {transform_indices = @transform_1, window_bounds = array<i64: 1, 1, 16>}, {pipeline_mode = #tpu.pipeline_mode<synchronous>, transform_indices = @transform_2, window_bounds = array<i64: 128, 384>}, {pipeline_mode = #tpu.pipeline_mode<synchronous>, transform_indices = @transform_3, window_bounds = array<i64: 1, 384>}, {pipeline_mode = #tpu.pipeline_mode<synchronous>, transform_indices = @transform_4, window_bounds = array<i64: 128, 128>}, {pipeline_mode = #tpu.pipeline_mode<synchronous>, transform_indices = @transform_5, window_bounds = array<i64: 1, 128>}, {pipeline_mode = #tpu.pipeline_mode<synchronous>, transform_indices = @transform_6, window_bounds = array<i64: 1, 128>}, {pipeline_mode = #tpu.pipeline_mode<synchronous>, transform_indices = @transform_7, window_bounds = array<i64: 1, 128>}, {pipeline_mode = #tpu.pipeline_mode<synchronous>, transform_indices = @transform_8, window_bounds = array<i64: 128, 256>}, {pipeline_mode = #tpu.pipeline_mode<synchronous>, transform_indices = @transform_9, window_bounds = array<i64: 1, 256>}, {pipeline_mode = #tpu.pipeline_mode<synchronous>, transform_indices = @transform_10, window_bounds = array<i64: 256, 128>}, {pipeline_mode = #tpu.pipeline_mode<synchronous>, transform_indices = @transform_11, window_bounds = array<i64: 1, 128>}, {pipeline_mode = #tpu.pipeline_mode<synchronous>, transform_indices = @transform_12, window_bounds = array<i64: 1, 128>}, {pipeline_mode = #tpu.pipeline_mode<synchronous>, transform_indices = @transform_13, window_bounds = array<i64: 1, 128>}, {transform_indices = @transform_14, window_bounds = array<i64: 1, 16, 128>}]} {
    %c0 = arith.constant 0 : index
    %c0_0 = arith.constant 0 : index
    %c0_1 = arith.constant 0 : index
    %0 = vector.load %arg1[%c0, %c0_0, %c0_1] : memref<1x16x128xf32, #tpu.memory_space<vmem>>, vector<1x16x128xf32>
    %1 = vector.shape_cast %0 : vector<1x16x128xf32> to vector<16x128xf32>
    %2 = arith.truncf %1 : vector<16x128xf32> to vector<16x128xbf16>
    %c0_2 = arith.constant 0 : index
    %c0_3 = arith.constant 0 : index
    %3 = vector.load %arg3[%c0_2, %c0_3] : memref<128x384xf32, #tpu.memory_space<vmem>>, vector<128x384xf32>
    %4 = arith.truncf %3 : vector<128x384xf32> to vector<128x384xbf16>
    %cst = arith.constant dense<0.000000e+00> : vector<16x384xf32>
    %5 = tpu.matmul %2, %4, %cst {dimension_numbers = #tpu.dot_dimension_numbers<[1], [0], [0], [1], [0, 0, 1, 1], [], []>} : vector<16x128xbf16>, vector<128x384xbf16>, vector<16x384xf32> -> vector<16x384xf32>
    %c0_4 = arith.constant 0 : index
    %c0_5 = arith.constant 0 : index
    %6 = vector.load %arg4[%c0_4, %c0_5] : memref<1x384xf32, #tpu.memory_space<vmem>>, vector<1x384xf32>
    %7 = vector.broadcast %6 : vector<1x384xf32> to vector<16x384xf32>
    %8 = arith.addf %5, %7 : vector<16x384xf32>
    %9 = vector.extract_strided_slice %8 {offsets = [0, 0], sizes = [16, 128], strides = [1, 1]} : vector<16x384xf32> to vector<16x128xf32>
    %10 = vector.shape_cast %9 : vector<16x128xf32> to vector<16x4x32xf32>
    %11 = tpu.transpose %10, [1, 0, 2] : vector<16x4x32xf32> -> vector<4x16x32xf32>
    %12 = arith.truncf %11 : vector<4x16x32xf32> to vector<4x16x32xbf16>
    %13 = vector.extract_strided_slice %8 {offsets = [0, 128], sizes = [16, 128], strides = [1, 1]} : vector<16x384xf32> to vector<16x128xf32>
    %14 = vector.shape_cast %13 : vector<16x128xf32> to vector<16x4x32xf32>
    %15 = tpu.transpose %14, [1, 0, 2] : vector<16x4x32xf32> -> vector<4x16x32xf32>
    %16 = arith.truncf %15 : vector<4x16x32xf32> to vector<4x16x32xbf16>
    %17 = vector.extract_strided_slice %8 {offsets = [0, 256], sizes = [16, 128], strides = [1, 1]} : vector<16x384xf32> to vector<16x128xf32>
    %18 = vector.shape_cast %17 : vector<16x128xf32> to vector<16x4x32xf32>
    %19 = tpu.transpose %18, [1, 0, 2] : vector<16x4x32xf32> -> vector<4x16x32xf32>
    %20 = arith.truncf %19 : vector<4x16x32xf32> to vector<4x16x32xbf16>
    "tpu.trace_start"() <{level = 10 : i32, message = "hqd,hkd->hqk"}> : () -> ()
    %cst_6 = arith.constant dense<0.000000e+00> : vector<4x16x16xf32>
    %21 = tpu.matmul %12, %16, %cst_6 {dimension_numbers = #tpu.dot_dimension_numbers<[2], [2], [1], [1], [0, 0, 0, 1, 1, 1], [0], [0]>} : vector<4x16x32xbf16>, vector<4x16x32xbf16>, vector<4x16x16xf32> -> vector<4x16x16xf32>
    "tpu.trace_stop"() : () -> ()
    %cst_7 = arith.constant 0.176776692 : f32
    %22 = vector.broadcast %cst_7 : f32 to vector<4x16x16xf32>
    %23 = arith.mulf %21, %22 : vector<4x16x16xf32>
    %c0_8 = arith.constant 0 : index
    %c0_9 = arith.constant 0 : index
    %c0_10 = arith.constant 0 : index
    %24 = vector.load %arg2[%c0_8, %c0_9, %c0_10] : memref<1x1x16xf32, #tpu.memory_space<vmem>>, vector<1x1x16xf32>
    %25 = vector.shape_cast %24 : vector<1x1x16xf32> to vector<1x16xf32>
    %26 = vector.shape_cast %25 : vector<1x16xf32> to vector<1x1x16xf32>
    %cst_11 = arith.constant 0.000000e+00 : f32
    %27 = vector.broadcast %cst_11 : f32 to vector<1x1x16xf32>
    %28 = arith.cmpf ogt, %26, %27 : vector<1x1x16xf32>
    %cst_12 = arith.constant -1.000000e+09 : f32
    %29 = vector.shape_cast %28 : vector<1x1x16xi1> to vector<1x1x16xi1>
    %30 = vector.broadcast %29 : vector<1x1x16xi1> to vector<4x16x16xi1>
    %31 = vector.broadcast %cst_12 : f32 to vector<4x16x16xf32>
    %32 = arith.select %30, %23, %31 : vector<4x16x16xi1>, vector<4x16x16xf32>
    %cst_13 = arith.constant dense<0xFF800000> : vector<4x16xf32>
    %33 = vector.multi_reduction <maximumf>, %32, %cst_13 [2] : vector<4x16x16xf32> to vector<4x16xf32>
    %34 = vector.shape_cast %33 : vector<4x16xf32> to vector<4x16x1xf32>
    %35 = vector.broadcast %34 : vector<4x16x1xf32> to vector<4x16x16xf32>
    %36 = arith.subf %32, %35 : vector<4x16x16xf32>
    %37 = math.exp %36 : vector<4x16x16xf32>
    %cst_14 = arith.constant dense<0.000000e+00> : vector<4x16xf32>
    %38 = vector.multi_reduction <add>, %37, %cst_14 [2] : vector<4x16x16xf32> to vector<4x16xf32>
    %39 = vector.shape_cast %38 : vector<4x16xf32> to vector<4x16x1xf32>
    %40 = tpu.reciprocal %39 {approx = true} : vector<4x16x1xf32> -> vector<4x16x1xf32>
    %41 = vector.broadcast %40 : vector<4x16x1xf32> to vector<4x16x16xf32>
    %42 = arith.mulf %37, %41 : vector<4x16x16xf32>
    %43 = arith.truncf %42 : vector<4x16x16xf32> to vector<4x16x16xbf16>
    "tpu.trace_start"() <{level = 10 : i32, message = "hqk,hkd->hqd"}> : () -> ()
    %cst_15 = arith.constant dense<0.000000e+00> : vector<4x16x32xf32>
    %44 = tpu.matmul %43, %20, %cst_15 {dimension_numbers = #tpu.dot_dimension_numbers<[2], [1], [1], [2], [0, 0, 0, 1, 1, 2], [0], [0]>} : vector<4x16x16xbf16>, vector<4x16x32xbf16>, vector<4x16x32xf32> -> vector<4x16x32xf32>
    "tpu.trace_stop"() : () -> ()
    %45 = tpu.transpose %44, [1, 0, 2] : vector<4x16x32xf32> -> vector<16x4x32xf32>
    %46 = vector.shape_cast %45 : vector<16x4x32xf32> to vector<16x128xf32>
    %47 = arith.truncf %46 : vector<16x128xf32> to vector<16x128xbf16>
    %c0_16 = arith.constant 0 : index
    %c0_17 = arith.constant 0 : index
    %48 = vector.load %arg5[%c0_16, %c0_17] : memref<128x128xf32, #tpu.memory_space<vmem>>, vector<128x128xf32>
    %49 = arith.truncf %48 : vector<128x128xf32> to vector<128x128xbf16>
    %cst_18 = arith.constant dense<0.000000e+00> : vector<16x128xf32>
    %50 = tpu.matmul %47, %49, %cst_18 {dimension_numbers = #tpu.dot_dimension_numbers<[1], [0], [0], [1], [0, 0, 1, 1], [], []>} : vector<16x128xbf16>, vector<128x128xbf16>, vector<16x128xf32> -> vector<16x128xf32>
    %c0_19 = arith.constant 0 : index
    %c0_20 = arith.constant 0 : index
    %51 = vector.load %arg6[%c0_19, %c0_20] : memref<1x128xf32, #tpu.memory_space<vmem>>, vector<1x128xf32>
    %52 = vector.broadcast %51 : vector<1x128xf32> to vector<16x128xf32>
    %53 = arith.addf %50, %52 : vector<16x128xf32>
    %54 = arith.addf %53, %1 : vector<16x128xf32>
    %cst_21 = arith.constant dense<0.000000e+00> : vector<16xf32>
    %55 = vector.multi_reduction <add>, %54, %cst_21 [1] : vector<16x128xf32> to vector<16xf32>
    %56 = vector.shape_cast %55 : vector<16xf32> to vector<16x1xf32>
    %cst_22 = arith.constant 1.280000e+02 : f32
    %57 = vector.broadcast %cst_22 : f32 to vector<16x1xf32>
    %58 = arith.divf %56, %57 : vector<16x1xf32>
    %59 = vector.broadcast %58 : vector<16x1xf32> to vector<16x128xf32>
    %60 = arith.subf %54, %59 : vector<16x128xf32>
    %61 = arith.mulf %60, %60 : vector<16x128xf32>
    %cst_23 = arith.constant dense<0.000000e+00> : vector<16xf32>
    %62 = vector.multi_reduction <add>, %61, %cst_23 [1] : vector<16x128xf32> to vector<16xf32>
    %63 = vector.shape_cast %62 : vector<16xf32> to vector<16x1xf32>
    %cst_24 = arith.constant 1.280000e+02 : f32
    %64 = vector.broadcast %cst_24 : f32 to vector<16x1xf32>
    %65 = arith.divf %63, %64 : vector<16x1xf32>
    %66 = vector.broadcast %58 : vector<16x1xf32> to vector<16x128xf32>
    %67 = arith.subf %54, %66 : vector<16x128xf32>
    %cst_25 = arith.constant 9.99999997E-7 : f32
    %68 = vector.broadcast %cst_25 : f32 to vector<16x1xf32>
    %69 = arith.addf %65, %68 : vector<16x1xf32>
    %70 = math.rsqrt %69 : vector<16x1xf32>
    %71 = vector.broadcast %70 : vector<16x1xf32> to vector<16x128xf32>
    %72 = arith.mulf %67, %71 : vector<16x128xf32>
    %c0_26 = arith.constant 0 : index
    %c0_27 = arith.constant 0 : index
    %73 = vector.load %arg7[%c0_26, %c0_27] : memref<1x128xf32, #tpu.memory_space<vmem>>, vector<1x128xf32>
    %74 = vector.broadcast %73 : vector<1x128xf32> to vector<16x128xf32>
    %75 = arith.mulf %72, %74 : vector<16x128xf32>
    %c0_28 = arith.constant 0 : index
    %c0_29 = arith.constant 0 : index
    %76 = vector.load %arg8[%c0_28, %c0_29] : memref<1x128xf32, #tpu.memory_space<vmem>>, vector<1x128xf32>
    %77 = vector.broadcast %76 : vector<1x128xf32> to vector<16x128xf32>
    %78 = arith.addf %75, %77 : vector<16x128xf32>
    %79 = arith.truncf %78 : vector<16x128xf32> to vector<16x128xbf16>
    %c0_30 = arith.constant 0 : index
    %c0_31 = arith.constant 0 : index
    %80 = vector.load %arg9[%c0_30, %c0_31] : memref<128x256xf32, #tpu.memory_space<vmem>>, vector<128x256xf32>
    %81 = arith.truncf %80 : vector<128x256xf32> to vector<128x256xbf16>
    %cst_32 = arith.constant dense<0.000000e+00> : vector<16x256xf32>
    %82 = tpu.matmul %79, %81, %cst_32 {dimension_numbers = #tpu.dot_dimension_numbers<[1], [0], [0], [1], [0, 0, 1, 1], [], []>} : vector<16x128xbf16>, vector<128x256xbf16>, vector<16x256xf32> -> vector<16x256xf32>
    %c0_33 = arith.constant 0 : index
    %c0_34 = arith.constant 0 : index
    %83 = vector.load %arg10[%c0_33, %c0_34] : memref<1x256xf32, #tpu.memory_space<vmem>>, vector<1x256xf32>
    %84 = vector.broadcast %83 : vector<1x256xf32> to vector<16x256xf32>
    %85 = arith.addf %82, %84 : vector<16x256xf32>
    %cst_35 = arith.constant 0.000000e+00 : f32
    %86 = vector.broadcast %cst_35 : f32 to vector<16x256xf32>
    %87 = arith.maximumf %85, %86 : vector<16x256xf32>
    %88 = arith.truncf %87 : vector<16x256xf32> to vector<16x256xbf16>
    %c0_36 = arith.constant 0 : index
    %c0_37 = arith.constant 0 : index
    %89 = vector.load %arg11[%c0_36, %c0_37] : memref<256x128xf32, #tpu.memory_space<vmem>>, vector<256x128xf32>
    %90 = arith.truncf %89 : vector<256x128xf32> to vector<256x128xbf16>
    %cst_38 = arith.constant dense<0.000000e+00> : vector<16x128xf32>
    %91 = tpu.matmul %88, %90, %cst_38 {dimension_numbers = #tpu.dot_dimension_numbers<[1], [0], [0], [1], [0, 0, 1, 1], [], []>} : vector<16x256xbf16>, vector<256x128xbf16>, vector<16x128xf32> -> vector<16x128xf32>
    %c0_39 = arith.constant 0 : index
    %c0_40 = arith.constant 0 : index
    %92 = vector.load %arg12[%c0_39, %c0_40] : memref<1x128xf32, #tpu.memory_space<vmem>>, vector<1x128xf32>
    %93 = vector.broadcast %92 : vector<1x128xf32> to vector<16x128xf32>
    %94 = arith.addf %91, %93 : vector<16x128xf32>
    %95 = arith.addf %94, %78 : vector<16x128xf32>
    %cst_41 = arith.constant dense<0.000000e+00> : vector<16xf32>
    %96 = vector.multi_reduction <add>, %95, %cst_41 [1] : vector<16x128xf32> to vector<16xf32>
    %97 = vector.shape_cast %96 : vector<16xf32> to vector<16x1xf32>
    %cst_42 = arith.constant 1.280000e+02 : f32
    %98 = vector.broadcast %cst_42 : f32 to vector<16x1xf32>
    %99 = arith.divf %97, %98 : vector<16x1xf32>
    %100 = vector.broadcast %99 : vector<16x1xf32> to vector<16x128xf32>
    %101 = arith.subf %95, %100 : vector<16x128xf32>
    %102 = arith.mulf %101, %101 : vector<16x128xf32>
    %cst_43 = arith.constant dense<0.000000e+00> : vector<16xf32>
    %103 = vector.multi_reduction <add>, %102, %cst_43 [1] : vector<16x128xf32> to vector<16xf32>
    %104 = vector.shape_cast %103 : vector<16xf32> to vector<16x1xf32>
    %cst_44 = arith.constant 1.280000e+02 : f32
    %105 = vector.broadcast %cst_44 : f32 to vector<16x1xf32>
    %106 = arith.divf %104, %105 : vector<16x1xf32>
    %107 = vector.broadcast %99 : vector<16x1xf32> to vector<16x128xf32>
    %108 = arith.subf %95, %107 : vector<16x128xf32>
    %cst_45 = arith.constant 9.99999997E-7 : f32
    %109 = vector.broadcast %cst_45 : f32 to vector<16x1xf32>
    %110 = arith.addf %106, %109 : vector<16x1xf32>
    %111 = math.rsqrt %110 : vector<16x1xf32>
    %112 = vector.broadcast %111 : vector<16x1xf32> to vector<16x128xf32>
    %113 = arith.mulf %108, %112 : vector<16x128xf32>
    %c0_46 = arith.constant 0 : index
    %c0_47 = arith.constant 0 : index
    %114 = vector.load %arg13[%c0_46, %c0_47] : memref<1x128xf32, #tpu.memory_space<vmem>>, vector<1x128xf32>
    %115 = vector.broadcast %114 : vector<1x128xf32> to vector<16x128xf32>
    %116 = arith.mulf %113, %115 : vector<16x128xf32>
    %c0_48 = arith.constant 0 : index
    %c0_49 = arith.constant 0 : index
    %117 = vector.load %arg14[%c0_48, %c0_49] : memref<1x128xf32, #tpu.memory_space<vmem>>, vector<1x128xf32>
    %118 = vector.broadcast %117 : vector<1x128xf32> to vector<16x128xf32>
    %119 = arith.addf %116, %118 : vector<16x128xf32>
    %c0_50 = arith.constant 0 : index
    %c0_51 = arith.constant 0 : index
    %c0_52 = arith.constant 0 : index
    %120 = vector.load %arg15[%c0_50, %c0_51, %c0_52] : memref<1x16x128xf32, #tpu.memory_space<vmem>>, vector<1x16x128xf32>
    %121 = vector.shape_cast %120 : vector<1x16x128xf32> to vector<16x128xf32>
    %122 = vector.shape_cast %119 : vector<16x128xf32> to vector<1x16x128xf32>
    tpu.vector_store %arg15[%c0_50, %c0_51, %c0_52], %122 {strides = array<i32>} : memref<1x16x128xf32, #tpu.memory_space<vmem>>, vector<1x16x128xf32>,
    return
  }
  func.func @transform_0(%arg0: i32) -> (i32, i32, i32) {
    %c0_i32 = arith.constant 0 : i32
    %c0_i32_0 = arith.constant 0 : i32
    %c0_i32_1 = arith.constant 0 : i32
    return %arg0, %c0_i32, %c0_i32_0 : i32, i32, i32
  }
  func.func @transform_1(%arg0: i32) -> (i32, i32, i32) {
    %c0_i32 = arith.constant 0 : i32
    %c0_i32_0 = arith.constant 0 : i32
    %c0_i32_1 = arith.constant 0 : i32
    return %arg0, %c0_i32, %c0_i32_0 : i32, i32, i32
  }
  func.func @transform_2(%arg0: i32) -> (i32, i32) {
    %c0_i32 = arith.constant 0 : i32
    %c0_i32_0 = arith.constant 0 : i32
    %c0_i32_1 = arith.constant 0 : i32
    return %c0_i32, %c0_i32_0 : i32, i32
  }
  func.func @transform_3(%arg0: i32) -> (i32, i32) {
    %c0_i32 = arith.constant 0 : i32
    %c0_i32_0 = arith.constant 0 : i32
    %c0_i32_1 = arith.constant 0 : i32
    return %c0_i32, %c0_i32_0 : i32, i32
  }
  func.func @transform_4(%arg0: i32) -> (i32, i32) {
    %c0_i32 = arith.constant 0 : i32
    %c0_i32_0 = arith.constant 0 : i32
    %c0_i32_1 = arith.constant 0 : i32
    return %c0_i32, %c0_i32_0 : i32, i32
  }
  func.func @transform_5(%arg0: i32) -> (i32, i32) {
    %c0_i32 = arith.constant 0 : i32
    %c0_i32_0 = arith.constant 0 : i32
    %c0_i32_1 = arith.constant 0 : i32
    return %c0_i32, %c0_i32_0 : i32, i32
  }
  func.func @transform_6(%arg0: i32) -> (i32, i32) {
    %c0_i32 = arith.constant 0 : i32
    %c0_i32_0 = arith.constant 0 : i32
    %c0_i32_1 = arith.constant 0 : i32
    return %c0_i32, %c0_i32_0 : i32, i32
  }
  func.func @transform_7(%arg0: i32) -> (i32, i32) {
    %c0_i32 = arith.constant 0 : i32
    %c0_i32_0 = arith.constant 0 : i32
    %c0_i32_1 = arith.constant 0 : i32
    return %c0_i32, %c0_i32_0 : i32, i32
  }
  func.func @transform_8(%arg0: i32) -> (i32, i32) {
    %c0_i32 = arith.constant 0 : i32
    %c0_i32_0 = arith.constant 0 : i32
    %c0_i32_1 = arith.constant 0 : i32
    return %c0_i32, %c0_i32_0 : i32, i32
  }
  func.func @transform_9(%arg0: i32) -> (i32, i32) {
    %c0_i32 = arith.constant 0 : i32
    %c0_i32_0 = arith.constant 0 : i32
    %c0_i32_1 = arith.constant 0 : i32
    return %c0_i32, %c0_i32_0 : i32, i32
  }
  func.func @transform_10(%arg0: i32) -> (i32, i32) {
    %c0_i32 = arith.constant 0 : i32
    %c0_i32_0 = arith.constant 0 : i32
    %c0_i32_1 = arith.constant 0 : i32
    return %c0_i32, %c0_i32_0 : i32, i32
  }
  func.func @transform_11(%arg0: i32) -> (i32, i32) {
    %c0_i32 = arith.constant 0 : i32
    %c0_i32_0 = arith.constant 0 : i32
    %c0_i32_1 = arith.constant 0 : i32
    return %c0_i32, %c0_i32_0 : i32, i32
  }
  func.func @transform_12(%arg0: i32) -> (i32, i32) {
    %c0_i32 = arith.constant 0 : i32
    %c0_i32_0 = arith.constant 0 : i32
    %c0_i32_1 = arith.constant 0 : i32
    return %c0_i32, %c0_i32_0 : i32, i32
  }
  func.func @transform_13(%arg0: i32) -> (i32, i32) {
    %c0_i32 = arith.constant 0 : i32
    %c0_i32_0 = arith.constant 0 : i32
    %c0_i32_1 = arith.constant 0 : i32
    return %c0_i32, %c0_i32_0 : i32, i32
  }
  func.func @transform_14(%arg0: i32) -> (i32, i32, i32) {
    %c0_i32 = arith.constant 0 : i32
    %c0_i32_0 = arith.constant 0 : i32
    %c0_i32_1 = arith.constant 0 : i32
    return %arg0, %c0_i32, %c0_i32_0 : i32, i32, i32
  }
}

</mosaic_0001>

<bundles_post_ra>
// kernel: tpu_custom_call.1
= control target key start
LH: loop header
LB: loop body
LE: loop exit
PB: predicated region body
PF: predicated region fallthrough
CT: control target
= control target key end

     0   :  { %s4313_s0 = inlined_call_operand.hbm [shape: f32[2,16,128], index: 0, kind: input, shape index: {}]   ;;  %s4314_s1 = inlined_call_operand.vmem [shape: f32[2,1,16], index: 1, kind: input, shape index: {}]   ;;  %s4315_s2 = inlined_call_operand.hbm [shape: f32[128,384], index: 2, kind: input, shape index: {}]   ;;  %s4316_s3 = inlined_call_operand.vmem [shape: f32[1,384], index: 3, kind: input, shape index: {}]   ;;  %s4317_s4 = inlined_call_operand.hbm [shape: f32[128,128], index: 4, kind: input, shape index: {}]   ;;  %s4318_s5 = inlined_call_operand.vmem [shape: f32[1,128], index: 5, kind: input, shape index: {}]   ;;  %s4319_s6 = inlined_call_operand.vmem [shape: f32[1,128], index: 6, kind: input, shape index: {}]   ;;  %s4320_s7 = inlined_call_operand.vmem [shape: f32[1,128], index: 7, kind: input, shape index: {}]   ;;  %s4321_s8 = inlined_call_operand.hbm [shape: f32[128,256], index: 8, kind: input, shape index: {}]   ;;  %s4322_s9 = inlined_call_operand.vmem [shape: f32[1,256], index: 9, kind: input, shape index: {}]   ;;  %s4323_s10 = inlined_call_operand.hbm [shape: f32[256,128], index: 10, kind: input, shape index: {}]   ;;  %s4324_s11 = inlined_call_operand.vmem [shape: f32[1,128], index: 11, kind: input, shape index: {}]   ;;  %s4325_s12 = inlined_call_operand.vmem [shape: f32[1,128], index: 12, kind: input, shape index: {}]   ;;  %s4326_s13 = inlined_call_operand.vmem [shape: f32[1,128], index: 13, kind: input, shape index: {}]   ;;  %s4327_s14 = inlined_call_operand.hbm [shape: f32[2,16,128], index: 14, kind: output, shape index: {}]  }
   0x1   :  { %4334 = sst [smem:[#allocation18_spill]] %s4315_s2 }
   0x2   :  { %4335 = sst [smem:[#allocation19_spill]] %s4322_s9 }
   0x3   :  { %4336 = sst [smem:[#allocation20_spill]] %s4324_s11 }
   0x4   :  { %4337 = sst [smem:[#allocation21_spill]] %s4325_s12 }
   0x5   :  { %4338 = sst [smem:[#allocation22_spill]] %s4326_s13 }
   0x6   :  { %4339 = sst [smem:[#allocation23_spill]] %s4327_s14 }
   0x7   :  { %19 = vsyncpa [#allocation3], 0 }
   0x8   :  { %21 = vsyncpa [#allocation3 + $0x1], 0 }
   0x9   :  { %22 = vsyncpa [#allocation6], 0 }
   0xa   :  { %23 = vsyncpa [#allocation9], 0 }
   0xb   :  { %24 = vsyncpa [#allocation4], 0 }
   0xc   :  { %26 = vsyncpa [#allocation4 + $0x1], 0  ;;  %s3582_s29 = smov 0   ;;  %s3584_s30 = smov 0  }
   0xd   :  { %s3586_s15 = smov 0   ;;  %s3588_s16 = smov 0  }
   0xe LB: > { %4340 = sst [smem:[#allocation16_spill]] %s3471_s29  ;;  %s3603_s17 = sadd.s32 4294967295, %s3483_s16   ;;  %s3483_s16 = sphi %s3588_s16, %s4372_s16   ;;  %s3479_s15 = sphi %s3586_s15, %s4371_s15   ;;  %s3475_s30 = sphi %s3584_s30, %s4370_s30   ;;  %s3471_s29 = sphi %s3582_s29, %s4369_s29  }
   0xf   : > { %s2909_s18 = sadd.s32 4294967294, %s3483_s16   ;;  %p52_p0 = scmp.ne.s32.totalorder %s3475_s30, %s3471_s29 }
  0x10   : > { %p4331_p1 = scmp.eq.s32.totalorder %s3603_s17, 0  ;;  %p360_p3 = scmp.eq.s32.totalorder %s2909_s18, 1 }
  0x11   : > { %p2910_p5 = scmp.ge.s32.totalorder %s3483_s16, 1  ;;  %p367_p7 = scmp.lt.s32.totalorder %s3483_s16, 3 }
  0x12   : > { %p3612_p4 = por %p4331_p1, %p52_p0  ;;  %p3617_p6 = por %p360_p3, %p52_p0 }
  0x13   : > { %p3622_p8 = pnand %p2910_p5, %p367_p7  ;;  %s3485_s22 = smov [#allocation5]  }
  0x14   : > { %s4341_s19 = scalar_select %p3612_p4, 1, 0 }
  0x15   : > { %s4342_s20 = scalar_select %p3617_p6, 1, 0 }
  0x16   : > { %s4344_s21 = scalar_select %p3622_p8, 1, 0 }
  0x17   : > { %4343 = sst [smem:[#allocation17_spill]] %s4342_s20  ;;  %s379_s23 = sshll.u32 %s3485_s22, 4  ;;  %s3626_s23 = int_to_ptr.vmem [resolvable:$true] %s379_s23 }
  0x18   : > { %p3127_p9 = pneg %p3622_p8  ;;  %s3486_s25 = smov [#allocation8]  }
  0x19   : > { %s417_s26 = sshll.u32 %s3486_s25, 4  ;;  %s4346_s2 = sld [smem:[#allocation18_spill]]  ;;  %s3637_s26 = int_to_ptr.vmem [resolvable:$true] %s417_s26 }
  0x1a   : > { %p3633_p11 = pnand %p3127_p9, %p4331_p1 }
  0x1c   : > { %p3647_p13 = pneg %p3633_p11 }
  0x1f   : > { %s3267_s18 = scalar_lea.hbm %s4346_s2, 6144 }
  0x20   : > { %p3268_p12 = scmp.ne.s32.totalorder %s4346_s2, %s3267_s18  ;;  %p3274_p5 = scmp.lt.u32.totalorder %s3267_s18, %s4346_s2 }
  0x22   : > { %p3270_p0 = pnand %p3647_p13, %p3268_p12 }
  0x24   : > { %p3271_p3 = pneg %p3270_p0 }
  0x26   : > { %p3276_p7 = pnand %p3274_p5, %p3271_p3 }
  0x28   : > { %3279 = shalt.err (!%p3276_p7)
}
  0x29   : > { %s3280_s20 = scalar_lea.vmem %s3626_s23, 6144  ;;  %p3288_p2 = scmp.lt.s32.totalorder %s3626_s23, %s3626_s23 }
  0x2a   : > { %p3281_p9 = scmp.ne.s32.totalorder %s3626_s23, %s3280_s20  ;;  %p3289_p6 = scmp.lt.s32.totalorder %s3280_s20, %s3280_s20 }
  0x2c   : > { %p3283_p10 = pnand %p3281_p9, %p3647_p13  ;;  %p3290_p12 = por %p3289_p6, %p3288_p2 }
  0x2e   : > { %p3284_p1 = pneg %p3283_p10 }
  0x30   : > { %p3291_p0 = pnand %p3290_p12, %p3284_p1 }
  0x32   : > { %3294 = shalt.err (!%p3291_p0)
}
  0x33   : > { %s3487_s27 = smov 384   ;;  %s3488_s14 = smov 24  }
  0x34   : > { %3130 = dma.hbm_to_vmem [thread:$0]  (!%p3633_p11), %s4346_s2, 6144, %s3626_s23, [#allocation6], %s3487_s27, %s3487_s27, %s3488_s14  }
  0x35   : > { %s3295_s13 = scalar_lea.hbm %s4321_s8, 4096 }
  0x36   : > { %p3296_p2 = scmp.ne.s32.totalorder %s4321_s8, %s3295_s13  ;;  %p3302_p10 = scmp.lt.u32.totalorder %s3295_s13, %s4321_s8 }
  0x38   : > { %p3298_p1 = pnand %p3296_p2, %p3647_p13 }
  0x3a   : > { %p3299_p6 = pneg %p3298_p1 }
  0x3c   : > { %p3304_p3 = pnand %p3302_p10, %p3299_p6 }
  0x3e   : > { %3307 = shalt.err (!%p3304_p3)
}
  0x3f   : > { %s3308_s23 = scalar_lea.vmem %s3637_s26, 4096  ;;  %p3316_p12 = scmp.lt.s32.totalorder %s3637_s26, %s3637_s26 }
  0x40   : > { %p3309_p5 = scmp.ne.s32.totalorder %s3637_s26, %s3308_s23  ;;  %p3317_p0 = scmp.lt.s32.totalorder %s3308_s23, %s3308_s23 }
  0x42   : > { %p3311_p7 = pnand %p3309_p5, %p3647_p13  ;;  %p3318_p2 = por %p3317_p0, %p3316_p12 }
  0x44   : > { %p3312_p9 = pneg %p3311_p7 }
  0x46   : > { %p3319_p1 = pnand %p3318_p2, %p3312_p9 }
  0x48   : > { %3322 = shalt.err (!%p3319_p1)
}
  0x49   : > { %s3489_s11 = smov 256   ;;  %s3490_s9 = smov 16  }
  0x4a   : > { %3136 = dma.hbm_to_vmem [thread:$0]  (!%p3633_p11), %s4321_s8, 4096, %s3637_s26, [#allocation9], %s3489_s11, %s3489_s11, %s3490_s9  }
  0x4b   : > { %s3491_s27 = smov [#allocation7]   ;;  %s3323_s22 = scalar_lea.hbm %s4317_s4, 2048 }
  0x4c   : > { %s395_s14 = sshll.u32 %s3491_s27, 4  ;;  %p3324_p6 = scmp.ne.s32.totalorder %s4317_s4, %s3323_s22  ;;  %s396_s14 = int_to_ptr.vmem [resolvable:$true] %s395_s14 }
  0x4d   : > { %p3330_p5 = scmp.lt.u32.totalorder %s3323_s22, %s4317_s4 }
  0x4e   : > { %p3326_p10 = pnand %p3324_p6, %p3647_p13 }
  0x50   : > { %p3327_p3 = pneg %p3326_p10 }
  0x52   : > { %p3332_p7 = pnand %p3330_p5, %p3327_p3 }
  0x54   : > { %3335 = shalt.err (!%p3332_p7)
}
  0x55   : > { %s3336_s26 = scalar_lea.vmem %s396_s14, 2048  ;;  %p3344_p2 = scmp.lt.s32.totalorder %s396_s14, %s396_s14 }
  0x56   : > { %p3337_p9 = scmp.ne.s32.totalorder %s396_s14, %s3336_s26  ;;  %p3345_p1 = scmp.lt.s32.totalorder %s3336_s26, %s3336_s26 }
  0x58   : > { %p3339_p12 = pnand %p3337_p9, %p3647_p13  ;;  %p3346_p4 = por %p3345_p1, %p3344_p2 }
  0x5a   : > { %p3340_p0 = pneg %p3339_p12 }
  0x5c   : > { %p3347_p8 = pnand %p3346_p4, %p3340_p0 }
  0x5e   : > { %3350 = shalt.err (!%p3347_p8)
}
  0x5f   : > { %s3492_s11 = smov 128   ;;  %s3493_s9 = smov 8  }
  0x60   : > { %3133 = dma.hbm_to_vmem [thread:$0]  (!%p3633_p11), %s4317_s4, 2048, %s396_s14, [#allocation6], %s3492_s11, %s3492_s11, %s3493_s9  }
  0x61   : > { %s3494_s13 = smov [#allocation10]   ;;  %s3351_s22 = scalar_lea.hbm %s4323_s10, 4096 }
  0x62   : > { %s433_s27 = sshll.u32 %s3494_s13, 4  ;;  %p3352_p4 = scmp.ne.s32.totalorder %s4323_s10, %s3351_s22  ;;  %s434_s27 = int_to_ptr.vmem [resolvable:$true] %s433_s27 }
  0x63   : > { %p3358_p10 = scmp.lt.u32.totalorder %s3351_s22, %s4323_s10 }
  0x64   : > { %p3354_p8 = pnand %p3352_p4, %p3647_p13 }
  0x66   : > { %p3355_p6 = pneg %p3354_p8 }
  0x68   : > { %p3360_p3 = pnand %p3358_p10, %p3355_p6 }
  0x6a   : > { %3363 = shalt.err (!%p3360_p3)
}
  0x6b   : > { %s3364_s14 = scalar_lea.vmem %s434_s27, 4096  ;;  %p3372_p12 = scmp.lt.s32.totalorder %s434_s27, %s434_s27 }
  0x6c   : > { %p3365_p5 = scmp.ne.s32.totalorder %s434_s27, %s3364_s14  ;;  %p3373_p0 = scmp.lt.s32.totalorder %s3364_s14, %s3364_s14 }
  0x6e   : > { %p3367_p7 = pnand %p3365_p5, %p3647_p13  ;;  %p3374_p2 = por %p3373_p0, %p3372_p12 }
  0x70   : > { %p3368_p9 = pneg %p3367_p7 }
  0x72   : > { %p3375_p1 = pnand %p3374_p2, %p3368_p9 }
  0x74   : > { %3378 = shalt.err (!%p3375_p1)
}
  0x75   : > { %3139 = dma.hbm_to_vmem [thread:$0]  (!%p3633_p11), %s4323_s10, 4096, %s434_s27, [#allocation9], %s3492_s11, %s3492_s11, %s3493_s9  }
  0x76   : > { %s3734_s29 = sadd.s32 1, %s3483_s16   ;;  %s39_s24 = sadd.s32 1, %s3479_s15 }
  0x77   : > { %s36_s13 = ssub.s32 %s3483_s16, %s3734_s29  ;;  %p46_p13 = scmp.ne.s32.totalorder %s3479_s15, %s3475_s30 }
  0x78   : > { %p37_p4 = scmp.eq.s32.totalorder %s36_s13, 0  ;;  %p47_p8 = scmp.eq.s32.totalorder %s3483_s16, 0 }
  0x79   : > { %p4348_p6 = scmp.eq.s32.totalorder %s3603_s17, 1  ;;  %p3152_p3 = scmp.lt.s32.totalorder %s3483_s16, 2 }
  0x7a   : > { %s3750_s18 = scalar_select %p37_p4, %s3479_s15, %s39_s24  }
  0x7b   : > { %p3744_p10 = por %p4348_p6, %p46_p13  ;;  %p48_p5 = por %p47_p8, %p46_p13 }
  0x7c   : > { %s456_s22 = sand.u32 1, %s3479_s15   ;;  %s2961_s27 = sshll.u32 %s3483_s16, 8 }
  0x7d   : > { %s2916_s25 = sshll.u32 %s456_s22, 4  ;;  %s3757_s26 = scalar_lea.hbm %s4313_s0, %s2961_s27 }
  0x7e   : > { %s460_s14 = scalar_lea.vmem [#allocation2], %s2916_s25  ;;  %p3761_p11 = pnand %p3152_p3, %p48_p5 }
  0x7f   : > { %s467_s2 = sshll.u32 %s460_s14, 4  ;;  %s3765_s24 = scalar_lea.sflag [#allocation3], %s456_s22  ;;  %s3759_s2 = int_to_ptr.vmem [resolvable:$true] %s467_s2 }
  0x80   : > { %s3379_s13 = scalar_lea.hbm %s3757_s26, 256  ;;  %p3381_p9 = pneg %p3761_p11 }
  0x81   : > { %p3380_p7 = scmp.ne.s32.totalorder %s3757_s26, %s3379_s13  ;;  %s3384_s20 = scalar_lea.hbm %s4313_s0, 512 }
  0x82   : > { %p3385_p2 = scmp.lt.u32.totalorder %s3757_s26, %s4313_s0  ;;  %p3386_p1 = scmp.lt.u32.totalorder %s3384_s20, %s3379_s13 }
  0x83   : > { %p3382_p12 = pnand %p3381_p9, %p3380_p7  ;;  %p3388_p4 = scmp.lt.u32.totalorder %s3379_s13, %s3757_s26 }
  0x84   : > { %p3387_p13 = por %p3386_p1, %p3385_p2 }
  0x85   : > { %p3383_p0 = pneg %p3382_p12 }
  0x86   : > { %p3389_p8 = por %p3388_p4, %p3387_p13 }
  0x88   : > { %p3390_p6 = pnand %p3389_p8, %p3383_p0 }
  0x8a   : > { %3393 = shalt.err (!%p3390_p6)
}
  0x8b   : > { %s3394_s22 = scalar_lea.vmem %s3759_s2, 256  ;;  %s3495_s25 = smov [#allocation2]  }
  0x8c   : > { %p3395_p3 = scmp.ne.s32.totalorder %s3759_s2, %s3394_s22  ;;  %s3399_s27 = sshll.u32 %s3495_s25, 4  ;;  %s3400_s27 = int_to_ptr.vmem [resolvable:$false] %s3399_s27 }
  0x8d   : > { %s3401_s23 = scalar_lea.vmem %s3400_s27, 512  ;;  %p3402_p12 = scmp.lt.s32.totalorder %s3759_s2, %s3400_s27 }
  0x8e   : > { %p3397_p5 = pnand %p3395_p3, %p3381_p9  ;;  %p3403_p2 = scmp.lt.s32.totalorder %s3401_s23, %s3394_s22 }
  0x90   : > { %p3398_p7 = pneg %p3397_p5  ;;  %p3404_p1 = por %p3403_p2, %p3402_p12 }
  0x92   : > { %p3405_p13 = pnand %p3404_p1, %p3398_p7 }
  0x94   : > { %3408 = shalt.err (!%p3405_p13)
}
  0x95   : > { %3143 = dma.hbm_to_vmem [thread:$0]  (!%p3761_p11), %s3757_s26, 256, %s3759_s2, %s3765_s24, %s3492_s11, %s3492_s11, %s3493_s9  }
  0x96   : > { %p4351_p9 = scmp.ne.s32.totalorder %s4344_s21, 0 }
  0x97   : > { %s3799_s13 = sand.u32 (!%p4351_p9), 1, %s3475_s30   ;;  %p4352_p0 = scmp.ne.s32.totalorder (!%p4351_p9), %s4341_s19, 0 }
  0x98   : > { %485 = sbr.rel (%p4351_p9) target bundleno = 2832 (0xb10), region = 76  ;;  %s2920_s20 = sshll.u32 (!%p4351_p9), %s3799_s13, 4 }
  0x99   : > { %s488_s14 = scalar_lea.sflag (!%p4351_p9), [#allocation3], %s3799_s13  ;;  %s3805_s12 = scalar_lea.vmem (!%p4351_p9), [#allocation2], %s2920_s20 }
  0x9f   : > { %3454 = dma.done.wait (%p4352_p0), %s488_s14, 256  }
  0xa0   : > { %3456 = vsyncadd (%p4352_p0), %s488_s14, 4294967040  ;;  %p4353_p11 = scmp.eq.s32.totalorder %s3603_s17, 0 }
  0xa2   : > { %3458 = dma.done.wait (%p4353_p11), [#allocation6], 8192   ;;  %p4354_p4 = pmov %p4353_p11 }
  0xa4   : > { %3460 = vsyncadd (%p4354_p4), [#allocation6], 4294959104  ;;  %p4355_p8 = pmov %p4354_p4 }
  0xa5   : > { %p4356_p6 = pmov %p4354_p4 }
  0xa6   : > { %3462 = dma.done.wait (%p4355_p8), [#allocation9], 8192  }
  0xa7   : > { %3464 = vsyncadd (%p4356_p6), [#allocation9], 4294959104  ;;  %v3496_v0 = vmov 0   ;;  %v563_v1 = vld [vmem:[#allocation5 + $0x8] sm:$0xff]  ;;  %v566_v2 = vld [vmem:[#allocation5 + $0x20] sm:$0xff]  ;;  %v3497_v54 = vmov 0.0   ;;  %v636_v56 = vlaneseq }
  0xa8   : > { %683 = vmatprep.mubr.bf16.mxu0 %v3496_v0  ;;  %v562_v3 = vld [vmem:[#allocation5] sm:$0xff]  ;;  %v611_v4 = vpack.c.bf16 %v566_v2, %v563_v1  ;;  %v565_v5 = vld [vmem:[#allocation5 + $0x18] sm:$0xff]  ;;  %v572_v7 = vld [vmem:[#allocation5 + $0x50] sm:$0xff]  ;;  %3019 = vmatprep.subr.bf16.mxu1 %v3497_v54  ;;  %s3498_s11 = smov 96   ;;  %s3499_s9 = smov 64   ;;  %vm3501_vm0 = vmmov 0  }
  0xa9   : > { %v569_v6 = vld [vmem:[#allocation5 + $0x38] sm:$0xff]  ;;  %v610_v8 = vpack.c.bf16 %v565_v5, %v562_v3  ;;  %v568_v10 = vld [vmem:[#allocation5 + $0x30] sm:$0xff]  ;;  %v571_v11 = vld [vmem:[#allocation5 + $0x48] sm:$0xff]  ;;  %v3828_v59 = vshrl.u32 %v636_v56, 7  ;;  %s3500_s26 = smov 32   ;;  %3035 = vmatprep.mubr.msk.bf16.mxu1 %vm3501_vm0, %v3497_v54  ;;  %vm1623_vm1 = vcmask 261120  }
  0xaa   : > { %v614_v9 = vpack.c.bf16 %v572_v7, %v569_v6  ;;  %v575_v12 = vld [vmem:[#allocation5 + $0x68] sm:$0xff]  ;;  %651 = vmatprep.subr.bf16.mxu0 %v611_v4  ;;  %v578_v13 = vld [vmem:[#allocation5 + $0x80] sm:$0xff]  ;;  %v613_v14 = vpack.c.bf16 %v571_v11, %v568_v10  ;;  %v577_v17 = vld [vmem:[#allocation5 + $0x78] sm:$0xff]  ;;  %p555_p3 = scmp.lt.s32.totalorder %s3603_s17, 1  ;;  %vm1836_vm4 = vcmask 130048   ;;  %vm2403_vm5 = vcmask 523264  }
  0xab   : > { %652 = vmatpush1.bf16.msra.mxu0 %v610_v8  ;;  %v617_v15 = vpack.c.bf16 %v578_v13, %v575_v12  ;;  %v574_v16 = vld [vmem:[#allocation5 + $0x60] sm:$0xff]  ;;  %v581_v18 = vld [vmem:[#allocation5 + $0x98] sm:$0xff]  ;;  %v584_v19 = vld [vmem:[#allocation5 + $0xb0] sm:$0xff]  ;;  %v3832_v63 = vsub.s32 0, %v3828_v59  ;;  %v642_v3 = vsub.s32 1, %v3828_v59  ;;  %vm2406_vm6 = vcmask 785408  }
  0xac   : > { %653 = vmatprep.subr.bf16.mxu0 %v614_v9  ;;  %v616_v20 = vpack.c.bf16 %v577_v17, %v574_v16  ;;  %v620_v21 = vpack.c.bf16 %v584_v19, %v581_v18  ;;  %v580_v22 = vld [vmem:[#allocation5 + $0x90] sm:$0xff]  ;;  %v583_v23 = vld [vmem:[#allocation5 + $0xa8] sm:$0xff]  ;;  %v590_v25 = vld [vmem:[#allocation5 + $0xe0] sm:$0xff]  ;;  %s556_s2 = scalar_select %p555_p3, %s3603_s17, 1 }
  0xad   : > { %v587_v24 = vld [vmem:[#allocation5 + $0xc8] sm:$0xff]  ;;  %v619_v26 = vpack.c.bf16 %v583_v23, %v580_v22  ;;  %v586_v28 = vld [vmem:[#allocation5 + $0xc0] sm:$0xff]  ;;  %v589_v29 = vld [vmem:[#allocation5 + $0xd8] sm:$0xff]  ;;  %s4360_s22 = sld [smem:[#allocation20_spill]]  ;;  %s4361_s23 = sld [smem:[#allocation21_spill]] }
  0xae   : > { %v623_v27 = vpack.c.bf16 %v590_v25, %v587_v24  ;;  %v593_v30 = vld [vmem:[#allocation5 + $0xf8] sm:$0xff]  ;;  %v596_v31 = vld [vmem:[#allocation5 + $0x110] sm:$0xff]  ;;  %v622_v32 = vpack.c.bf16 %v589_v29, %v586_v28  ;;  %v595_v35 = vld [vmem:[#allocation5 + $0x108] sm:$0xff]  ;;  %v3502_v29 = vmov 1983009808   ;;  %s557_s25 = scalar_lea.vmem %s4314_s1, %s556_s2  ;;  %s4362_s19 = sld [smem:[#allocation22_spill]] }
  0xaf   : > { %654 = vmatpush1.bf16.msra.mxu0 %v613_v14  ;;  %v626_v33 = vpack.c.bf16 %v596_v31, %v593_v30  ;;  %v592_v34 = vld [vmem:[#allocation5 + $0xf0] sm:$0xff]  ;;  %v599_v36 = vld [vmem:[#allocation5 + $0x128] sm:$0xff]  ;;  %v602_v37 = vld [vmem:[#allocation5 + $0x140] sm:$0xff]  ;;  %v758_v30 = vunpack.c.l.s4 %v3502_v29  ;;  %s2962_s21 = sshll.u32 %s3603_s17, 8  ;;  %s4363_s24 = sld [smem:[#allocation23_spill]] }
  0xb0   : > { %655 = vmatprep.subr.bf16.mxu0 %v617_v15  ;;  %v625_v38 = vpack.c.bf16 %v595_v35, %v592_v34  ;;  %v629_v39 = vpack.c.bf16 %v602_v37, %v599_v36  ;;  %v598_v40 = vld [vmem:[#allocation5 + $0x120] sm:$0xff]  ;;  %v601_v41 = vld [vmem:[#allocation5 + $0x138] sm:$0xff]  ;;  %v608_v43 = vld [vmem:[#allocation5 + $0x170] sm:$0xff] }
  0xb1   : > { %v605_v42 = vld [vmem:[#allocation5 + $0x158] sm:$0xff]  ;;  %v628_v44 = vpack.c.bf16 %v601_v41, %v598_v40  ;;  %v604_v46 = vld [vmem:[#allocation5 + $0x150] sm:$0xff]  ;;  %v607_v47 = vld [vmem:[#allocation5 + $0x168] sm:$0xff]  ;;  %v759_v35 = vunpack.c.0.s8 %v758_v30 }
  0xb2   : > { %v632_v45 = vpack.c.bf16 %v608_v43, %v605_v42  ;;  %v631_v48 = vpack.c.bf16 %v607_v47, %v604_v46  ;;  %v559_v49 = vld [vmem:[%s3805_s12] sm:$0xff]  ;;  %v560_v50 = vld [vmem:[%s3805_s12 + $0x8] sm:$0xff] }
  0xb3   : > { %656 = vmatpush1.bf16.msra.mxu0 %v616_v20  ;;  %v3822_v51 = vpack.c.bf16 %v560_v50, %v559_v49  ;;  %v564_v52 = vld [vmem:[#allocation5 + $0x10] sm:$0xff]  ;;  %v567_v53 = vld [vmem:[#allocation5 + $0x28] sm:$0xff]  ;;  %v570_v57 = vld [vmem:[#allocation5 + $0x40] sm:$0xff] }
  0xb4   : > { %657 = vmatprep.subr.bf16.mxu0 %v620_v21  ;;  %v612_v55 = vpack.c.bf16 %v567_v53, %v564_v52  ;;  %v573_v58 = vld [vmem:[#allocation5 + $0x58] sm:$0xff]  ;;  %v576_v61 = vld [vmem:[#allocation5 + $0x70] sm:$0xff]  ;;  %v579_v62 = vld [vmem:[#allocation5 + $0x88] sm:$0xff] }
  0xb5   : > { %v615_v60 = vpack.c.bf16 %v573_v58, %v570_v57  ;;  %v618_v1 = vpack.c.bf16 %v579_v62, %v576_v61  ;;  %v3837_v2 = vld [vmem:[%s4316_s3] sm:$0x7]  ;;  %v585_v5 = vld [vmem:[#allocation5 + $0xb8] sm:$0xff]  ;;  %v588_v10 = vld [vmem:[#allocation5 + $0xd0] sm:$0xff] }
  0xb6   : > { %3020 = vmatpush3.bf16.msra.mxu1 %v612_v55  ;;  %v582_v4 = vld [vmem:[#allocation5 + $0xa0] sm:$0xff]  ;;  %v639_v6 = vrot.slane %v3837_v2, %v3832_v63  ;;  %v643_v8 = vrot.slane %v3837_v2, %v642_v3  ;;  %v591_v11 = vld [vmem:[#allocation5 + $0xe8] sm:$0xff]  ;;  %v597_v20 = vld [vmem:[#allocation5 + $0x118] sm:$0xff] }
  0xb7   : > { %658 = vmatpush1.bf16.msra.mxu0 %v619_v26  ;;  %3021 = vmatprep.subr.bf16.mxu1 %v3497_v54  ;;  %v621_v7 = vpack.c.bf16 %v585_v5, %v582_v4  ;;  %v624_v14 = vpack.c.bf16 %v591_v11, %v588_v10  ;;  %v594_v19 = vld [vmem:[#allocation5 + $0x100] sm:$0xff]  ;;  %v600_v23 = vld [vmem:[#allocation5 + $0x130] sm:$0xff]  ;;  %v603_v24 = vld [vmem:[#allocation5 + $0x148] sm:$0xff] }
  0xb8   : > { %659 = vmatprep.subr.bf16.mxu0 %v623_v27  ;;  %v627_v21 = vpack.c.bf16 %v597_v20, %v594_v19  ;;  %v630_v25 = vpack.c.bf16 %v603_v24, %v600_v23  ;;  %v606_v26 = vld [vmem:[#allocation5 + $0x160] sm:$0xff]  ;;  %v609_v27 = vld [vmem:[#allocation5 + $0x178] sm:$0xff] }
  0xb9   : > { %v633_v28 = vpack.c.bf16 %v609_v27, %v606_v26 }
  0xba   : > { %3022 = vmatpush3.bf16.msra.mxu1 %v615_v60 }
  0xbb   : > { %660 = vmatpush1.bf16.msra.mxu0 %v622_v32  ;;  %3023 = vmatprep.subr.bf16.mxu1 %v3497_v54 }
  0xbc   : > { %661 = vmatprep.subr.bf16.mxu0 %v626_v33  ;;  %v3503_v33 = vmov 1934713408  }
  0xbd   : > { %v790_v34 = vunpack.c.l.s4 %v3503_v33 }
  0xbe   : > { %3024 = vmatpush3.bf16.msra.mxu1 %v618_v1 }
  0xbf   : > { %662 = vmatpush1.bf16.msra.mxu0 %v625_v38  ;;  %3025 = vmatprep.subr.bf16.mxu1 %v3497_v54  ;;  %v791_v38 = vunpack.c.0.s8 %v790_v34 }
  0xc0   : > { %663 = vmatprep.subr.bf16.mxu0 %v629_v39  ;;  %v3890_v39 = vsub.s32 %v759_v35, %v3828_v59 }
  0xc1   : > { %v3893_v46 = vsub.s32 %v791_v38, %v3828_v59 }
  0xc2   : > { %3026 = vmatpush3.bf16.msra.mxu1 %v621_v7 }
  0xc3   : > { %664 = vmatpush1.bf16.msra.mxu0 %v628_v44  ;;  %3027 = vmatprep.subr.bf16.mxu1 %v3497_v54 }
  0xc4   : > { %665 = vmatprep.subr.bf16.mxu0 %v632_v45 }
  0xc6   : > { %3028 = vmatpush3.bf16.msra.mxu1 %v624_v14 }
  0xc7   : > { %666 = vmatpush1.bf16.msra.mxu0 %v631_v48  ;;  %3029 = vmatprep.subr.bf16.mxu1 %v3497_v54 }
  0xc8   : > { %3063 = vmatprep.subr.bf16.mxu0 %v3497_v54 }
  0xca   : > { %684 = vmatmul.mubr.bf16.vlgmr.msra.gmra.mrb[0].mxu0 %v3822_v51  ;;  %3030 = vmatpush3.bf16.msra.mxu1 %v627_v21 }
  0xcb   : > { %3031 = vmatprep.subr.bf16.mxu1 %v3497_v54  ;;  %3065 = vmatprep.mubr.msk.bf16.mxu0 %vm3501_vm0, %v3497_v54 }
  0xce   : > { %3032 = vmatpush3.bf16.msra.mxu1 %v630_v25 }
  0xcf   : > { %3033 = vmatprep.subr.bf16.mxu1 %v3497_v54 }
  0xd2   : > { %3034 = vmatpush3.bf16.msra.mxu1 %v633_v28 }
  0xd3   : > { %3039 = vmatprep.subr.bf16.mxu1 %v3497_v54 }
  0xd5   : > { %3036 = vmatmul.mubr.bf16.vlgmr.msra.gmra.mrb[0].mxu1 %v3822_v51 }
  0xd6   : > { %3041 = vmatprep.mubr.msk.bf16.mxu1 %vm3501_vm0, %v3497_v54 }
 0x19d   : > { %v685_v9 = vpop.f32.mrb[0].mxu0 }
 0x19e   : > { %v3847_v12 = vadd.f32 %v685_v9, %v639_v6  ;;  %v687_v13 = vpop.f32.mrb[1].mxu0 }
 0x19f   : > { %v688_v15 = vadd.f32 %v687_v13, %v643_v8  ;;  %v689_v16 = vpop.f32.mrb[2].mxu0 }
 0x1a0   : > { %v691_v17 = vpop.f32.mrb[3].mxu0  ;;  %737 = vrot.lane.b32.xlu0 %v3847_v12, %s3498_s11  ;;  %v3853_v18 = vadd.f32 %v689_v16, %v639_v6 }
 0x1a1   : > { %1039 = vrot.lane.b32.xlu1 %v688_v15, %s3499_s9  ;;  %v3858_v22 = vadd.f32 %v691_v17, %v643_v8 }
 0x1a4   : > { %1033 = vrot.lane.b32.xlu0 %v688_v15, %s3498_s11 }
 0x1a5   : > { %739 = vrot.lane.b32.xlu1 %v3853_v18, %s3498_s11 }
 0x1a8   : > { %1045 = vrot.lane.b32.xlu0 %v688_v15, %s3500_s26 }
 0x1a9   : > { %1041 = vrot.lane.b32.xlu1 %v3858_v22, %s3499_s9 }
 0x1ac   : > { %1035 = vrot.lane.b32.xlu0 %v3858_v22, %s3498_s11 }
 0x1ad   : > { %1047 = vrot.lane.b32.xlu1 %v3858_v22, %s3500_s26 }
 0x1b0   : > { %743 = vrot.lane.b32.xlu0 %v3847_v12, %s3499_s9 }
 0x1b1   : > { %745 = vrot.lane.b32.xlu1 %v3853_v18, %s3499_s9 }
 0x1b4   : > { %749 = vrot.lane.b32.xlu0 %v3847_v12, %s3500_s26 }
 0x1b5   : > { %751 = vrot.lane.b32.xlu1 %v3853_v18, %s3500_s26 }
 0x212   : > { %v3885_v31 = vpop.permute.xlu0 %737 }
 0x213   : > { %v1040_v32 = vpop.permute.xlu1 %1039 }
 0x214   : > { %v1051_v40 = vcombine.low %v688_v15, %v1040_v32  ;;  %v1052_v41 = vcombine.high %v688_v15, %v1040_v32 }
 0x216   : > { %v1034_v36 = vpop.permute.xlu0 %1033  ;;  %v1059_v47 = vrot.slane %v1051_v40, %v3890_v39  ;;  %v1066_v48 = vrot.slane %v1052_v41, %v3890_v39 }
 0x217   : > { %v3887_v37 = vpop.permute.xlu1 %739 }
 0x21a   : > { %v1046_v42 = vpop.permute.xlu0 %1045 }
 0x21b   : > { %v1067_v43 = vcombine.low %v1034_v36, %v1046_v42  ;;  %v1068_v44 = vcombine.high %v1034_v36, %v1046_v42  ;;  %v1042_v45 = vpop.permute.xlu1 %1041 }
 0x21c   : > { %v1119_v51 = vcombine.low %v3858_v22, %v1042_v45  ;;  %v1120_v52 = vcombine.high %v3858_v22, %v1042_v45 }
 0x21d   : > { %v1075_v49 = vrot.slane %v1067_v43, %v3890_v39  ;;  %v1082_v50 = vrot.slane %v1068_v44, %v3890_v39 }
 0x21e   : > { %v1036_v53 = vpop.permute.xlu0 %1035  ;;  %v1127_v7 = vrot.slane %v1119_v51, %v3890_v39  ;;  %v1134_v8 = vrot.slane %v1120_v52, %v3890_v39 }
 0x21f   : > { %v1083_v55 = vcombine.low %v1059_v47, %v1075_v49  ;;  %v1084_v56 = vcombine.high %v1059_v47, %v1075_v49  ;;  %v1099_v57 = vcombine.low %v1066_v48, %v1082_v50  ;;  %v1100_v58 = vcombine.high %v1066_v48, %v1082_v50  ;;  %v1048_v60 = vpop.permute.xlu1 %1047 }
 0x220   : > { %v1135_v61 = vcombine.low %v1036_v53, %v1048_v60  ;;  %v1136_v62 = vcombine.high %v1036_v53, %v1048_v60 }
 0x221   : > { %v1091_v1 = vrot.slane %v1083_v55, %v3893_v46  ;;  %v1098_v4 = vrot.slane %v1084_v56, %v3893_v46  ;;  %v1107_v5 = vrot.slane %v1099_v57, %v3893_v46  ;;  %v1114_v6 = vrot.slane %v1100_v58, %v3893_v46 }
 0x222   : > { %v1143_v9 = vrot.slane %v1135_v61, %v3890_v39  ;;  %v1150_v10 = vrot.slane %v1136_v62, %v3890_v39  ;;  %v744_v11 = vpop.permute.xlu0 %743 }
 0x223   : > { %v1187_v13 = vcombine.low %v1091_v1, %v1098_v4  ;;  %v2930_v14 = vcombine.high %v1091_v1, %v1098_v4  ;;  %v1203_v15 = vcombine.low %v1107_v5, %v1114_v6  ;;  %v2931_v16 = vcombine.high %v1107_v5, %v1114_v6  ;;  %v746_v17 = vpop.permute.xlu1 %745 }
 0x224   : > { %v1151_v19 = vcombine.low %v1127_v7, %v1143_v9  ;;  %v1152_v20 = vcombine.high %v1127_v7, %v1143_v9  ;;  %v1167_v21 = vcombine.low %v1134_v8, %v1150_v10  ;;  %v1168_v22 = vcombine.high %v1134_v8, %v1150_v10 }
 0x225   : > { %v3910_v23 = vrot.slane %v1187_v13, %v3890_v39  ;;  %v3913_v24 = vrot.slane %v2930_v14, %v3890_v39  ;;  %v3916_v25 = vrot.slane %v1203_v15, %v3890_v39  ;;  %v3919_v26 = vrot.slane %v2931_v16, %v3890_v39 }
 0x226   : > { %v1159_v27 = vrot.slane %v1151_v19, %v3893_v46  ;;  %v1166_v28 = vrot.slane %v1152_v20, %v3893_v46  ;;  %v1175_v29 = vrot.slane %v1167_v21, %v3893_v46  ;;  %v1182_v30 = vrot.slane %v1168_v22, %v3893_v46  ;;  %v750_v42 = vpop.permute.xlu0 %749 }
 0x227   : > { %v755_v32 = vcombine.low %v3847_v12, %v744_v11  ;;  %v756_v33 = vcombine.high %v3847_v12, %v744_v11  ;;  %v823_v34 = vcombine.low %v3853_v18, %v746_v17  ;;  %v824_v35 = vcombine.high %v3853_v18, %v746_v17  ;;  %v752_v43 = vpop.permute.xlu1 %751 }
 0x228   : > { %v1255_v36 = vcombine.low %v1159_v27, %v1166_v28  ;;  %v2932_v38 = vcombine.high %v1159_v27, %v1166_v28  ;;  %v1271_v40 = vcombine.low %v1175_v29, %v1182_v30  ;;  %v2933_v41 = vcombine.high %v1175_v29, %v1182_v30 }
 0x229   : > { %v763_v44 = vrot.slane %v755_v32, %v3890_v39  ;;  %v770_v45 = vrot.slane %v756_v33, %v3890_v39  ;;  %v771_v49 = vcombine.low %v3885_v31, %v750_v42  ;;  %v772_v50 = vcombine.high %v3885_v31, %v750_v42 }
 0x22a   : > { %v3932_v47 = vrot.slane %v1255_v36, %v3890_v39  ;;  %v3935_v48 = vrot.slane %v2932_v38, %v3890_v39  ;;  %v3938_v12 = vrot.slane %v1271_v40, %v3890_v39  ;;  %v3941_v18 = vrot.slane %v2933_v41, %v3890_v39 }
 0x22b   : > { %v839_v51 = vcombine.low %v3887_v37, %v752_v43  ;;  %v840_v52 = vcombine.high %v3887_v37, %v752_v43  ;;  %v831_v53 = vrot.slane %v823_v34, %v3890_v39  ;;  %v838_v55 = vrot.slane %v824_v35, %v3890_v39 }
 0x22c   : > { %v1219_v56 = vcombine.low %v3910_v23, %v3913_v24  ;;  %v1235_v57 = vcombine.low %v3916_v25, %v3919_v26  ;;  %v779_v58 = vrot.slane %v771_v49, %v3890_v39  ;;  %v786_v60 = vrot.slane %v772_v50, %v3890_v39 }
 0x22d   : > { %v847_v31 = vrot.slane %v839_v51, %v3890_v39  ;;  %v854_v61 = vrot.slane %v840_v52, %v3890_v39  ;;  %v1287_v1 = vcombine.low %v3932_v47, %v3935_v48  ;;  %v1303_v4 = vcombine.low %v3938_v12, %v3941_v18 }
 0x22e   : > { %v3958_v37 = vrot.slane %v1219_v56, %v3893_v46  ;;  %v1243_v62 = vrot.slane %v1235_v57, %v3893_v46  ;;  %v787_v5 = vcombine.low %v763_v44, %v779_v58  ;;  %v788_v6 = vcombine.high %v763_v44, %v779_v58 }
 0x22f   : > { %v803_v7 = vcombine.low %v770_v45, %v786_v60  ;;  %v804_v8 = vcombine.high %v770_v45, %v786_v60  ;;  %v855_v9 = vcombine.low %v831_v53, %v847_v31  ;;  %v856_v10 = vcombine.high %v831_v53, %v847_v31 }
 0x230   : > { %v871_v11 = vcombine.low %v838_v55, %v854_v61  ;;  %v872_v13 = vcombine.high %v838_v55, %v854_v61  ;;  %v795_v14 = vrot.slane %v787_v5, %v3893_v46  ;;  %v802_v15 = vrot.slane %v788_v6, %v3893_v46 }
 0x231   : > { %v811_v16 = vrot.slane %v803_v7, %v3893_v46  ;;  %v818_v17 = vrot.slane %v804_v8, %v3893_v46  ;;  %v863_v19 = vrot.slane %v855_v9, %v3893_v46  ;;  %v870_v20 = vrot.slane %v856_v10, %v3893_v46 }
 0x232   : > { %v879_v21 = vrot.slane %v871_v11, %v3893_v46  ;;  %v886_v22 = vrot.slane %v872_v13, %v3893_v46  ;;  %v891_v27 = vcombine.low %v795_v14, %v802_v15  ;;  %v2926_v28 = vcombine.high %v795_v14, %v802_v15 }
 0x233   : > { %v907_v29 = vcombine.low %v811_v16, %v818_v17  ;;  %v2927_v30 = vcombine.high %v811_v16, %v818_v17  ;;  %v959_v32 = vcombine.low %v863_v19, %v870_v20  ;;  %v2928_v33 = vcombine.high %v863_v19, %v870_v20 }
 0x234   : > { %v975_v34 = vcombine.low %v879_v21, %v886_v22  ;;  %v2929_v35 = vcombine.high %v879_v21, %v886_v22  ;;  %v898_v36 = vrot.slane %v891_v27, %v3890_v39  ;;  %v906_v38 = vrot.slane %v2926_v28, %v3890_v39 }
 0x235   : > { %v914_v40 = vrot.slane %v907_v29, %v3890_v39  ;;  %v922_v41 = vrot.slane %v2927_v30, %v3890_v39  ;;  %v966_v42 = vrot.slane %v959_v32, %v3890_v39  ;;  %v974_v43 = vrot.slane %v2928_v33, %v3890_v39 }
 0x236   : > { %v982_v44 = vrot.slane %v975_v34, %v3890_v39  ;;  %v990_v45 = vrot.slane %v2929_v35, %v3890_v39  ;;  %v923_v49 = vcombine.low %v898_v36, %v906_v38  ;;  %v1295_v51 = vrot.slane %v1287_v1, %v3893_v46 }
 0x237   : > { %v939_v50 = vcombine.low %v914_v40, %v922_v41  ;;  %v1311_v52 = vrot.slane %v1303_v4, %v3893_v46  ;;  %v991_v53 = vcombine.low %v966_v42, %v974_v43  ;;  %v1251_v31 = vcombine.low %v3958_v37, %v1243_v62 }
 0x238   : > { %v1007_v55 = vcombine.low %v982_v44, %v990_v45  ;;  %v931_v56 = vrot.slane %v923_v49, %v3893_v46  ;;  %v1288_v8 = vcombine.high %v3932_v47, %v3935_v48  ;;  %v1304_v9 = vcombine.high %v3938_v12, %v3941_v18 }
 0x239   : > { %v947_v57 = vrot.slane %v939_v50, %v3893_v46  ;;  %v999_v58 = vrot.slane %v991_v53, %v3893_v46  ;;  %v1319_v61 = vcombine.low %v1295_v51, %v1311_v52  ;;  %v1320_v4 = vcombine.high %v1295_v51, %v1311_v52  ;;  %v1820_v51 = vld [vmem:[%s557_s25] sm:$0x1]  ;;  %s2776_s25 = scalar_lea.sflag [#allocation4], %s3799_s13 }
 0x23a   : > { %v1015_v60 = vrot.slane %v1007_v55, %v3893_v46  ;;  %v1252_v10 = vcombine.high %v3958_v37, %v1243_v62  ;;  %v1220_v11 = vcombine.high %v3910_v23, %v3913_v24  ;;  %v1236_v13 = vcombine.high %v3916_v25, %v3919_v26 }
 0x23b   : > { %v1323_v5 = vpack.c.bf16 %v1319_v61, %v1251_v31  ;;  %v955_v6 = vcombine.low %v931_v56, %v947_v57  ;;  %v1302_v16 = vrot.slane %v1288_v8, %v3893_v46  ;;  %v1318_v47 = vrot.slane %v1304_v9, %v3893_v46 }
 0x23c   : > { %v1023_v7 = vcombine.low %v999_v58, %v1015_v60  ;;  %v1324_v15 = vpack.c.bf16 %v1320_v4, %v1252_v10  ;;  %v1234_v48 = vrot.slane %v1220_v11, %v3893_v46  ;;  %v1250_v12 = vrot.slane %v1236_v13, %v3893_v46 }
 0x23d   : > { %v1628_v1 = vsel %vm1623_vm1, %v1323_v5, 0  ;;  %v1321_v37 = vcombine.low %v1302_v16, %v1318_v47  ;;  %v924_v62 = vcombine.high %v898_v36, %v906_v38  ;;  %v940_v23 = vcombine.high %v914_v40, %v922_v41 }
 0x23e   : > { %3040 = vmatpush3.bf16.xpose.msra.mxu1 %v1628_v1  ;;  %v1027_v14 = vpack.c.bf16 %v1023_v7, %v955_v6  ;;  %v1675_v18 = vsel %vm1623_vm1, %v1324_v15, 0  ;;  %v992_v24 = vcombine.high %v966_v42, %v974_v43  ;;  %v1008_v25 = vcombine.high %v982_v44, %v990_v45  ;;  %v4025_v44 = vpop.f32.mrb[0].mxu1 }
 0x23f   : > { %3045 = vmatprep.subr.bf16.mxu1 %v3497_v54  ;;  %v956_v26 = vcombine.high %v931_v56, %v947_v57  ;;  %v1024_v17 = vcombine.high %v999_v58, %v1015_v60  ;;  %v1253_v19 = vcombine.low %v1234_v48, %v1250_v12  ;;  %v938_v21 = vrot.slane %v924_v62, %v3893_v46  ;;  %v3037_v45 = vpop.f32.mrb[1].mxu1 }
 0x240   : > { %v954_v22 = vrot.slane %v940_v23, %v3893_v46  ;;  %v1006_v27 = vrot.slane %v992_v24, %v3893_v46  ;;  %v1022_v28 = vrot.slane %v1008_v25, %v3893_v46  ;;  %v1322_v32 = vcombine.high %v1302_v16, %v1318_v47  ;;  %v4027_v49 = vpop.f32.mrb[2].mxu1 }
 0x241   : > { %v1325_v20 = vpack.c.bf16 %v1321_v37, %v1253_v19  ;;  %v1028_v29 = vpack.c.bf16 %v1024_v17, %v956_v26  ;;  %v1254_v35 = vcombine.high %v1234_v48, %v1250_v12  ;;  %v3038_v50 = vpop.f32.mrb[3].mxu1  ;;  %vm1821_vm2 = vcmp.gt.f32.partialorder %v1820_v51, 0.0 }
 0x242   : > { %v957_v33 = vcombine.low %v938_v21, %v954_v22  ;;  %v1025_v34 = vcombine.low %v1006_v27, %v1022_v28  ;;  %v958_v41 = vcombine.high %v938_v21, %v954_v22  ;;  %v1026_v42 = vcombine.high %v1006_v27, %v1022_v28 }
 0x243   : > { %v1722_v30 = vsel %vm1623_vm1, %v1325_v20, 0  ;;  %v1326_v36 = vpack.c.bf16 %v1322_v32, %v1254_v35  ;;  %v1822_v52 = vsel %vm1821_vm2, 1, %v3496_v0 }
 0x244   : > { %v1029_v38 = vpack.c.bf16 %v1025_v34, %v957_v33  ;;  %v1030_v43 = vpack.c.bf16 %v1026_v42, %v958_v41  ;;  %v1826_v53 = vrot.slane %v1822_v52, %v3832_v63  ;;  %v646_v34 = vsub.s32 2, %v3828_v59  ;;  %v2953_v59 = vld [vmem:[%s4360_s22] ss:$0 sm:$0xff]  ;;  %s4267_s22 = scalar_lea.hbm %s4363_s24, %s2962_s21 }
 0x245   : > { %3042 = vmatmul.mubr.msk.bf16.vlgmr.msra.gmra.mrb[4].mxu1 %vm1623_vm1, %v1027_v14  ;;  %v1769_v40 = vsel %vm1623_vm1, %v1326_v36, 0 }
 0x246   : > { %3046 = vmatpush3.bf16.xpose.msra.mxu1 %v1675_v18  ;;  %3047 = vmatprep.mubr.msk.bf16.mxu1 %vm3501_vm0, %v3497_v54  ;;  %vm4036_vm3 = vcmp.eq.s32.totalorder %v1826_v53, 1  ;;  %v647_v35 = vrot.slane %v3837_v2, %v646_v34 }
 0x247   : > { %3051 = vmatprep.subr.bf16.mxu1 %v3497_v54 }
 0x248   : > { %v4070_v36 = vadd.f32 %v4025_v44, %v647_v35 }
 0x24d   : > { %3048 = vmatmul.mubr.msk.bf16.vlgmr.msra.gmra.mrb[8].mxu1 %vm1623_vm1, %v1028_v29 }
 0x24e   : > { %3052 = vmatpush3.bf16.xpose.msra.mxu1 %v1722_v30  ;;  %3053 = vmatprep.mubr.msk.bf16.mxu1 %vm3501_vm0, %v3497_v54 }
 0x24f   : > { %3057 = vmatprep.subr.bf16.mxu1 %v3497_v54 }
 0x255   : > { %3054 = vmatmul.mubr.msk.bf16.vlgmr.msra.gmra.mrb[12].mxu1 %vm1623_vm1, %v1029_v38  ;;  %v4077_v38 = vadd.f32 %v4027_v49, %v647_v35 }
 0x256   : > { %3058 = vmatpush3.bf16.xpose.msra.mxu1 %v1769_v40  ;;  %3059 = vmatprep.mubr.msk.bf16.mxu1 %vm3501_vm0, %v3497_v54 }
 0x257   : > { %3069 = vmatprep.subr.bf16.mxu1 %v3497_v54 }
 0x25d   : > { %3060 = vmatmul.mubr.msk.bf16.vlgmr.msra.gmra.mrb[16].mxu1 %vm1623_vm1, %v1030_v43 }
 0x25e   : > { %3071 = vmatprep.mubr.msk.bf16.mxu1 %vm3501_vm0, %v3497_v54 }
 0x318   : > { %v1664_v56 = vpop.f32.mrb[4].mxu1 }
 0x319   : > { %v1812_v57 = vmul.f32 0.17677669, %v1664_v56  ;;  %v3043_v58 = vpop.f32.mrb[5].mxu1 }
 0x31a   : > { %v1667_v60 = vpop.f32.mrb[6].mxu1 }
 0x31b   : > { %v1813_v31 = vmul.f32 0.17677669, %v1667_v60  ;;  %v3044_v61 = vpop.f32.mrb[7].mxu1  ;;  %v1828_v5 = vsel %vm4036_vm3, %v1812_v57, -1e+09 }
 0x31c   : > { %v1837_v6 = vsel %vm1836_vm4, %v1828_v5, -inf }
 0x31d   : > { %1838 = vmax.xlane.f32.xlu0 %v1837_v6  ;;  %v1829_v7 = vsel %vm4036_vm3, %v1813_v31, -1e+09 }
 0x31e   : > { %v1840_v1 = vsel %vm1836_vm4, %v1829_v7, -inf }
 0x31f   : > { %1841 = vmax.xlane.f32.xlu1 %v1840_v1 }
 0x320   : > { %v1711_v4 = vpop.f32.mrb[8].mxu1 }
 0x321   : > { %v1814_v8 = vmul.f32 0.17677669, %v1711_v4  ;;  %v3049_v9 = vpop.f32.mrb[9].mxu1 }
 0x322   : > { %v1714_v10 = vpop.f32.mrb[10].mxu1 }
 0x323   : > { %v1815_v11 = vmul.f32 0.17677669, %v1714_v10  ;;  %v3050_v13 = vpop.f32.mrb[11].mxu1  ;;  %v1830_v14 = vsel %vm4036_vm3, %v1814_v8, -1e+09 }
 0x324   : > { %v1843_v15 = vsel %vm1836_vm4, %v1830_v14, -inf }
 0x325   : > { %1844 = vmax.xlane.f32.xlu0 %v1843_v15  ;;  %v1831_v16 = vsel %vm4036_vm3, %v1815_v11, -1e+09 }
 0x326   : > { %v1846_v48 = vsel %vm1836_vm4, %v1831_v16, -inf }
 0x328   : > { %v1758_v47 = vpop.f32.mrb[12].mxu1 }
 0x329   : > { %v1816_v12 = vmul.f32 0.17677669, %v1758_v47  ;;  %1847 = vmax.xlane.f32.xlu0 %v1846_v48  ;;  %v3055_v18 = vpop.f32.mrb[13].mxu1 }
 0x32a   : > { %v1761_v37 = vpop.f32.mrb[14].mxu1 }
 0x32b   : > { %v1817_v62 = vmul.f32 0.17677669, %v1761_v37  ;;  %v3056_v23 = vpop.f32.mrb[15].mxu1  ;;  %v1832_v24 = vsel %vm4036_vm3, %v1816_v12, -1e+09 }
 0x32c   : > { %v1849_v25 = vsel %vm1836_vm4, %v1832_v24, -inf }
 0x32d   : > { %1850 = vmax.xlane.f32.xlu1 %v1849_v25  ;;  %v4057_v26 = vsel %vm4036_vm3, %v1817_v62, -1e+09 }
 0x32e   : > { %v1852_v17 = vsel %vm1836_vm4, %v4057_v26, -inf }
 0x32f   : > { %1853 = vmax.xlane.f32.xlu0 %v1852_v17 }
 0x330   : > { %v1805_v19 = vpop.f32.mrb[16].mxu1 }
 0x331   : > { %v1818_v20 = vmul.f32 0.17677669, %v1805_v19  ;;  %v3061_v21 = vpop.f32.mrb[17].mxu1 }
 0x332   : > { %v1808_v22 = vpop.f32.mrb[18].mxu1 }
 0x333   : > { %v1819_v27 = vmul.f32 0.17677669, %v1808_v22  ;;  %v3062_v28 = vpop.f32.mrb[19].mxu1  ;;  %v1834_v29 = vsel %vm4036_vm3, %v1818_v20, -1e+09 }
 0x334   : > { %v1855_v30 = vsel %vm1836_vm4, %v1834_v29, -inf }
 0x335   : > { %1856 = vmax.xlane.f32.xlu1 %v1855_v30  ;;  %v1835_v32 = vsel %vm4036_vm3, %v1819_v27, -1e+09 }
 0x336   : > { %v1858_v33 = vsel %vm1836_vm4, %v1835_v32, -inf }
 0x337   : > { %1859 = vmax.xlane.f32.xlu0 %v1858_v33 }
 0x346   : > { %1329 = vrot.lane.b32.xlu1 %v4070_v36, %s3498_s11 }
 0x34a   : > { %1335 = vrot.lane.b32.xlu1 %v4070_v36, %s3499_s9 }
 0x34d   : > { %1331 = vrot.lane.b32.xlu0 %v4077_v38, %s3498_s11 }
 0x34e   : > { %1337 = vrot.lane.b32.xlu1 %v4077_v38, %s3499_s9 }
 0x351   : > { %1341 = vrot.lane.b32.xlu0 %v4070_v36, %s3500_s26 }
 0x3aa   : > { %v1839_v2 = vpop.xlane.xlu0 %1838 }
 0x3ab   : > { %v1861_v40 = vsub.f32 %v1828_v5, %v1839_v2 }
 0x3ac   : > { %v1842_v41 = vpop.xlane.xlu1 %1841 }
 0x3ad   : > { %v1869_v42 = vmul.f32 1.442695, %v1861_v40  ;;  %v1862_v43 = vsub.f32 %v1829_v7, %v1842_v41 }
 0x3af   : > { %3225 = vpow2.f32 %v1869_v42  ;;  %v1871_v44 = vmul.f32 1.442695, %v1862_v43 }
 0x3b1   : > { %3227 = vpow2.f32 %v1871_v44 }
 0x3b2   : > { %v1845_v45 = vpop.xlane.xlu0 %1844 }
 0x3b3   : > { %v1863_v49 = vsub.f32 %v1830_v14, %v1845_v45 }
 0x3b5   : > { %v1873_v50 = vmul.f32 1.442695, %v1863_v49 }
 0x3b6   : > { %v1848_v51 = vpop.xlane.xlu0 %1847 }
 0x3b7   : > { %3229 = vpow2.f32 %v1873_v50  ;;  %v1864_v52 = vsub.f32 %v1831_v16, %v1848_v51 }
 0x3b9   : > { %v4085_v53 = vpop.eup %3225  ;;  %v1875_v55 = vmul.f32 1.442695, %v1864_v52 }
 0x3ba   : > { %v1851_v56 = vpop.xlane.xlu1 %1850  ;;  %v1885_v57 = vsel %vm1836_vm4, %v4085_v53, 0.0 }
 0x3bb   : > { %v4089_v58 = vpop.eup %3227  ;;  %3231 = vpow2.f32 %v1875_v55  ;;  %v1865_v60 = vsub.f32 %v1832_v24, %v1851_v56  ;;  %1886 = vadd.xlane.f32.xlu1 %v1885_v57 }
 0x3bc   : > { %v1888_v31 = vsel %vm1836_vm4, %v4089_v58, 0.0  ;;  %v1854_v5 = vpop.xlane.xlu0 %1853 }
 0x3bd   : > { %v1877_v61 = vmul.f32 1.442695, %v1865_v60  ;;  %1889 = vadd.xlane.f32.xlu0 %v1888_v31  ;;  %v1866_v37 = vsub.f32 %v4057_v26, %v1854_v5 }
 0x3bf   : > { %3233 = vpow2.f32 %v1877_v61  ;;  %v1879_v62 = vmul.f32 1.442695, %v1866_v37 }
 0x3c1   : > { %v4093_v6 = vpop.eup %3229 }
 0x3c2   : > { %v1857_v7 = vpop.xlane.xlu1 %1856  ;;  %v1891_v1 = vsel %vm1836_vm4, %v4093_v6, 0.0 }
 0x3c3   : > { %v1867_v4 = vsub.f32 %v1834_v29, %v1857_v7  ;;  %1892 = vadd.xlane.f32.xlu1 %v1891_v1 }
 0x3c4   : > { %v1860_v8 = vpop.xlane.xlu0 %1859 }
 0x3c5   : > { %v4097_v9 = vpop.eup %3231  ;;  %v1881_v10 = vmul.f32 1.442695, %v1867_v4  ;;  %v1868_v11 = vsub.f32 %v1835_v32, %v1860_v8 }
 0x3c6   : > { %v1894_v13 = vsel %vm1836_vm4, %v4097_v9, 0.0  ;;  %v1330_v17 = vpop.permute.xlu1 %1329 }
 0x3c7   : > { %3235 = vpow2.f32 %v1881_v10  ;;  %v1883_v14 = vmul.f32 1.442695, %v1868_v11  ;;  %1895 = vadd.xlane.f32.xlu0 %v1894_v13 }
 0x3c8   : > { %v1332_v25 = vpop.permute.xlu0 %1331 }
 0x3c9   : > { %v4101_v15 = vpop.eup %3233  ;;  %3237 = vpow2.f32 %v1883_v14 }
 0x3ca   : > { %v1897_v16 = vsel %vm1836_vm4, %v4101_v15, 0.0  ;;  %3239 = vpow2.f32 %v1879_v62  ;;  %v1336_v20 = vpop.permute.xlu1 %1335 }
 0x3cb   : > { %1898 = vadd.xlane.f32.xlu0 %v1897_v16  ;;  %v1347_v27 = vcombine.low %v4070_v36, %v1336_v20  ;;  %v1348_v28 = vcombine.high %v4070_v36, %v1336_v20 }
 0x3cc   : > { %v1342_v19 = vpop.permute.xlu0 %1341 }
 0x3cd   : > { %v1363_v21 = vcombine.low %v1330_v17, %v1342_v19  ;;  %v1364_v22 = vcombine.high %v1330_v17, %v1342_v19  ;;  %v1355_v32 = vrot.slane %v1347_v27, %v3890_v39  ;;  %v1362_v33 = vrot.slane %v1348_v28, %v3890_v39 }
 0x3ce   : > { %v1338_v30 = vpop.permute.xlu1 %1337 }
 0x3cf   : > { %v1371_v26 = vrot.slane %v1363_v21, %v3890_v39  ;;  %v1378_v29 = vrot.slane %v1364_v22, %v3890_v39  ;;  %v1415_v50 = vcombine.low %v4077_v38, %v1338_v30  ;;  %v1416_v51 = vcombine.high %v4077_v38, %v1338_v30 }
 0x3d1   : > { %v4105_v47 = vpop.eup %3235  ;;  %v1379_v34 = vcombine.low %v1355_v32, %v1371_v26  ;;  %v1380_v35 = vcombine.high %v1355_v32, %v1371_v26  ;;  %v1395_v2 = vcombine.low %v1362_v33, %v1378_v29  ;;  %v1396_v40 = vcombine.high %v1362_v33, %v1378_v29 }
 0x3d2   : > { %v1903_v48 = vsel %vm1836_vm4, %v4105_v47, 0.0  ;;  %v1423_v7 = vrot.slane %v1415_v50, %v3890_v39  ;;  %v1430_v1 = vrot.slane %v1416_v51, %v3890_v39 }
 0x3d3   : > { %v4109_v12 = vpop.eup %3237  ;;  %1904 = vadd.xlane.f32.xlu0 %v1903_v48  ;;  %v1387_v42 = vrot.slane %v1379_v34, %v3893_v46  ;;  %v1394_v43 = vrot.slane %v1380_v35, %v3893_v46  ;;  %v1403_v36 = vrot.slane %v1395_v2, %v3893_v46  ;;  %v1410_v44 = vrot.slane %v1396_v40, %v3893_v46 }
 0x3d4   : > { %1343 = vrot.lane.b32.xlu1 %v4077_v38, %s3500_s26  ;;  %v1906_v18 = vsel %vm1836_vm4, %v4109_v12, 0.0  ;;  %v4116_v23 = vpop.eup %3239 }
 0x3d5   : > { %v1900_v24 = vsel %vm1836_vm4, %v4116_v23, 0.0  ;;  %v1483_v52 = vcombine.low %v1387_v42, %v1394_v43  ;;  %v2934_v55 = vcombine.high %v1387_v42, %v1394_v43  ;;  %v1499_v56 = vcombine.low %v1403_v36, %v1410_v44 }
 0x3d6   : > { %v2935_v57 = vcombine.high %v1403_v36, %v1410_v44 }
 0x3d7   : > { %1907 = vadd.xlane.f32.xlu0 %v1906_v18  ;;  %v1490_v4 = vrot.slane %v1483_v52, %v3890_v39  ;;  %v1498_v10 = vrot.slane %v2934_v55, %v3890_v39  ;;  %v1506_v11 = vrot.slane %v1499_v56, %v3890_v39 }
 0x3d8   : > { %v1514_v13 = vrot.slane %v2935_v57, %v3890_v39 }
 0x3d9   : > { %v1515_v19 = vcombine.low %v1490_v4, %v1498_v10  ;;  %v1516_v40 = vcombine.high %v1490_v4, %v1498_v10 }
 0x3da   : > { %v1531_v20 = vcombine.low %v1506_v11, %v1514_v13 }
 0x3db   : > { %v1523_v35 = vrot.slane %v1515_v19, %v3893_v46 }
 0x3dc   : > { %v1539_v2 = vrot.slane %v1531_v20, %v3893_v46 }
 0x3de   : > { %v1547_v57 = vcombine.low %v1523_v35, %v1539_v2 }
 0x3f8   : > { %1901 = vadd.xlane.f32.xlu1 %v1900_v24 }
 0x448   : > { %v1887_v41 = vpop.xlane.xlu1 %1886 }
 0x449   : > { %3241 = vrcp.f32 %v1887_v41  ;;  %v1532_v41 = vcombine.high %v1506_v11, %v1514_v13 }
 0x44a   : > { %v1890_v49 = vpop.xlane.xlu0 %1889 }
 0x44b   : > { %3243 = vrcp.f32 %v1890_v49 }
 0x450   : > { %v1893_v45 = vpop.xlane.xlu1 %1892 }
 0x453   : > { %v3242_v33 = vpop.eup %3241 }
 0x454   : > { %v1344_v60 = vpop.permute.xlu1 %1343  ;;  %v1896_v5 = vpop.xlane.xlu0 %1895 }
 0x455   : > { %v1431_v31 = vcombine.low %v1332_v25, %v1344_v60  ;;  %v1432_v61 = vcombine.high %v1332_v25, %v1344_v60  ;;  %3245 = vrcp.f32 %v1896_v5  ;;  %v3244_v42 = vpop.eup %3243  ;;  %v1530_v60 = vrot.slane %v1516_v40, %v3893_v46  ;;  %v2419_v40 = vld [vmem:[#allocation7 + $0x48] sm:$0xff] }
 0x456   : > { %3247 = vrcp.f32 %v1893_v45  ;;  %v1918_v4 = vmul.f32 %v3244_v42, %v4089_v58  ;;  %v2420_v42 = vld [vmem:[#allocation7 + $0x50] sm:$0xff] }
 0x457   : > { %v1439_v8 = vrot.slane %v1431_v31, %v3890_v39  ;;  %v1446_v38 = vrot.slane %v1432_v61, %v3890_v39  ;;  %v1546_v31 = vrot.slane %v1532_v41, %v3893_v46 }
 0x458   : > { %v4144_v17 = vpop.xlane.xlu0 %1898 }
 0x459   : > { %v1447_v14 = vcombine.low %v1423_v7, %v1439_v8  ;;  %v1448_v16 = vcombine.high %v1423_v7, %v1439_v8  ;;  %v1463_v48 = vcombine.low %v1430_v1, %v1446_v38  ;;  %v1464_v18 = vcombine.high %v1430_v1, %v1446_v38 }
 0x45a   : > { %v1548_v7 = vcombine.high %v1523_v35, %v1539_v2  ;;  %v2418_v2 = vld [vmem:[#allocation7 + $0x40] sm:$0xff] }
 0x45b   : > { %v1455_v37 = vrot.slane %v1447_v14, %v3893_v46  ;;  %v1462_v62 = vrot.slane %v1448_v16, %v3893_v46  ;;  %v1471_v24 = vrot.slane %v1463_v48, %v3893_v46  ;;  %v1478_v25 = vrot.slane %v1464_v18, %v3893_v46 }
 0x45c   : > { %v1917_v14 = vmul.f32 %v3242_v33, %v4085_v53  ;;  %v1549_v48 = vcombine.low %v1530_v60, %v1546_v31  ;;  %v1550_v18 = vcombine.high %v1530_v60, %v1546_v31  ;;  %v2415_v33 = vld [vmem:[#allocation7 + $0x28] sm:$0xff]  ;;  %v2430_v41 = vpack.c.bf16 %v2419_v40, %v2418_v2 }
 0x45d   : > { %v1551_v21 = vcombine.low %v1455_v37, %v1462_v62  ;;  %v2936_v22 = vcombine.high %v1455_v37, %v1462_v62  ;;  %v1567_v27 = vcombine.low %v1471_v24, %v1478_v25  ;;  %v2937_v28 = vcombine.high %v1471_v24, %v1478_v25 }
 0x45e   : > { %v1925_v37 = vpack.c.bf16 %v1918_v4, %v1917_v14 }
 0x45f   : > { %v1558_v26 = vrot.slane %v1551_v21, %v3890_v39  ;;  %v1566_v29 = vrot.slane %v2936_v22, %v3890_v39  ;;  %v1574_v30 = vrot.slane %v1567_v27, %v3890_v39  ;;  %v1582_v32 = vrot.slane %v2937_v28, %v3890_v39  ;;  %v3246_v45 = vpop.eup %3245 }
 0x460   : > { %v1905_v34 = vpop.xlane.xlu0 %1904  ;;  %v3248_v55 = vpop.eup %3247  ;;  %v1920_v8 = vmul.f32 %v3246_v45, %v4097_v9 }
 0x461   : > { %v1583_v43 = vcombine.low %v1558_v26, %v1566_v29  ;;  %v1599_v36 = vcombine.low %v1574_v30, %v1582_v32  ;;  %v1584_v44 = vcombine.high %v1558_v26, %v1566_v29  ;;  %v1600_v49 = vcombine.high %v1574_v30, %v1582_v32  ;;  %v2412_v29 = vld [vmem:[#allocation7 + $0x10] sm:$0xff]  ;;  %v2413_v30 = vld [vmem:[#allocation7 + $0x18] sm:$0xff]  ;;  %v2414_v32 = vld [vmem:[#allocation7 + $0x20] sm:$0xff] }
 0x462   : > { %3249 = vrcp.f32 %v1905_v34  ;;  %v1919_v16 = vmul.f32 %v3248_v55, %v4093_v6  ;;  %v2417_v34 = vld [vmem:[#allocation7 + $0x38] sm:$0xff] }
 0x463   : > { %v1591_v50 = vrot.slane %v1583_v43, %v3893_v46  ;;  %v1607_v51 = vrot.slane %v1599_v36, %v3893_v46  ;;  %v1598_v52 = vrot.slane %v1584_v44, %v3893_v46  ;;  %v1614_v61 = vrot.slane %v1600_v49, %v3893_v46  ;;  %v2421_v43 = vld [vmem:[#allocation7 + $0x58] sm:$0xff] }
 0x464   : > { %v1908_v56 = vpop.xlane.xlu0 %1907  ;;  %v1926_v62 = vpack.c.bf16 %v1920_v8, %v1919_v16  ;;  %v2431_v36 = vpack.c.bf16 %v2421_v43, %v2420_v42 }
 0x465   : > { %3251 = vrcp.f32 %v1908_v56  ;;  %v1615_v5 = vcombine.low %v1591_v50, %v1607_v51  ;;  %v1616_v1 = vcombine.high %v1591_v50, %v1607_v51  ;;  %v1617_v11 = vcombine.low %v1598_v52, %v1614_v61 }
 0x466   : > { %v1618_v13 = vcombine.high %v1598_v52, %v1614_v61  ;;  %3253 = vrcp.f32 %v4144_v17  ;;  %v2427_v17 = vpack.c.bf16 %v2413_v30, %v2412_v29 }
 0x467   : > { %v1619_v38 = vpack.c.bf16 %v1615_v5, %v1547_v57  ;;  %v1620_v10 = vpack.c.bf16 %v1616_v1, %v1548_v7  ;;  %v1621_v58 = vpack.c.bf16 %v1617_v11, %v1549_v48 }
 0x468   : > { %v1622_v9 = vpack.c.bf16 %v1618_v13, %v1550_v18 }
 0x469   : > { %3064 = vmatpush3.bf16.msra.mxu0 %v1619_v38  ;;  %3070 = vmatpush3.bf16.msra.mxu1 %v1620_v10 }
 0x46a   : > { %3075 = vmatprep.subr.bf16.mxu0 %v3497_v54  ;;  %3081 = vmatprep.subr.bf16.mxu1 %v3497_v54 }
 0x46c   : > { %3066 = vmatmul.mubr.msk.bf16.vlgmr.msra.gmra.mrb[4].mxu0 %vm1836_vm4, %v1925_v37  ;;  %3072 = vmatmul.mubr.msk.bf16.vlgmr.msra.gmra.mrb[20].mxu1 %vm1836_vm4, %v1926_v62  ;;  %v3250_v24 = vpop.eup %3249 }
 0x46d   : > { %3076 = vmatpush3.bf16.msra.mxu0 %v1621_v58  ;;  %3082 = vmatpush3.bf16.msra.mxu1 %v1622_v9  ;;  %v1923_v6 = vmul.f32 %v3250_v24, %v4105_v47  ;;  %v2410_v47 = vld [vmem:[#allocation7] sm:$0xff] }
 0x46e   : > { %3083 = vmatprep.mubr.msk.bf16.mxu1 %vm3501_vm0, %v3497_v54  ;;  %3077 = vmatprep.mubr.msk.bf16.mxu0 %vm3501_vm0, %v3497_v54 }
 0x46f   : > { %v3252_v53 = vpop.eup %3251  ;;  %3087 = vmatprep.subr.bf16.mxu0 %v3497_v54 }
 0x470   : > { %v1924_v25 = vmul.f32 %v3252_v53, %v4109_v12  ;;  %v3254_v21 = vpop.eup %3253  ;;  %v2411_v12 = vld [vmem:[#allocation7 + $0x8] sm:$0xff] }
 0x471   : > { %v1921_v27 = vmul.f32 %v3254_v21, %v4101_v15  ;;  %v2428_v15 = vpack.c.bf16 %v2415_v33, %v2414_v32 }
 0x472   : > { %v1928_v19 = vpack.c.bf16 %v1924_v25, %v1923_v6 }
 0x474   : > { %3084 = vmatmul.mubr.msk.bf16.vlgmr.msra.gmra.mrb[24].mxu1 %vm1836_vm4, %v1928_v19 }
 0x475   : > { %2618 = vmatprep.mubr.bf16.mxu1 %v3496_v0  ;;  %v2426_v0 = vpack.c.bf16 %v2411_v12, %v2410_v47 }
 0x485   : > { %v1902_v20 = vpop.xlane.xlu1 %1901 }
 0x486   : > { %3255 = vrcp.f32 %v1902_v20 }
 0x490   : > { %v3256_v22 = vpop.eup %3255 }
 0x491   : > { %v1922_v28 = vmul.f32 %v3256_v22, %v4116_v23  ;;  %v2416_v23 = vld [vmem:[#allocation7 + $0x30] sm:$0xff] }
 0x492   : > { %v2429_v35 = vpack.c.bf16 %v2417_v34, %v2416_v23 }
 0x493   : > { %v1927_v26 = vpack.c.bf16 %v1922_v28, %v1921_v27 }
 0x495   : > { %3078 = vmatmul.mubr.msk.bf16.vlgmr.msra.gmra.mrb[8].mxu0 %vm1836_vm4, %v1927_v26 }
 0x496   : > { %3103 = vmatprep.mubr.msk.bf16.mxu0 %vm3501_vm0, %v3497_v54  ;;  %3088 = vmatpush3.bf16.msra.mxu0 %v2426_v0 }
 0x497   : > { %3089 = vmatprep.subr.bf16.mxu0 %v3497_v54 }
 0x49a   : > { %3090 = vmatpush3.bf16.msra.mxu0 %v2427_v17 }
 0x49b   : > { %3091 = vmatprep.subr.bf16.mxu0 %v3497_v54 }
 0x49e   : > { %3092 = vmatpush3.bf16.msra.mxu0 %v2428_v15 }
 0x49f   : > { %3093 = vmatprep.subr.bf16.mxu0 %v3497_v54 }
 0x4a2   : > { %3094 = vmatpush3.bf16.msra.mxu0 %v2429_v35 }
 0x4a3   : > { %3095 = vmatprep.subr.bf16.mxu0 %v3497_v54 }
 0x4a6   : > { %3096 = vmatpush3.bf16.msra.mxu0 %v2430_v41 }
 0x4a7   : > { %3097 = vmatprep.subr.bf16.mxu0 %v3497_v54 }
 0x4aa   : > { %3098 = vmatpush3.bf16.msra.mxu0 %v2431_v36 }
 0x4ab   : > { %3099 = vmatprep.subr.bf16.mxu0 %v3497_v54 }
 0x53f   : > { %v1966_v44 = vpop.f32.mrb[4].mxu0  ;;  %v2010_v45 = vpop.f32.mrb[20].mxu1 }
 0x540   : > { %v3067_v49 = vpop.f32.mrb[5].mxu0  ;;  %v3073_v50 = vpop.f32.mrb[21].mxu1 }
 0x541   : > { %v1969_v51 = vpop.f32.mrb[6].mxu0  ;;  %v2013_v52 = vpop.f32.mrb[22].mxu1 }
 0x542   : > { %v3068_v55 = vpop.f32.mrb[7].mxu0  ;;  %v3074_v56 = vpop.f32.mrb[23].mxu1 }
 0x547   : > { %v2098_v57 = vpop.f32.mrb[24].mxu1 }
 0x548   : > { %v2121_v60 = vcombine.low %v2010_v45, %v2098_v57  ;;  %v2122_v31 = vcombine.high %v2010_v45, %v2098_v57  ;;  %v3085_v61 = vpop.f32.mrb[25].mxu1 }
 0x549   : > { %v2101_v5 = vpop.f32.mrb[26].mxu1 }
 0x54a   : > { %v2189_v7 = vcombine.low %v2013_v52, %v2101_v5  ;;  %v2190_v1 = vcombine.high %v2013_v52, %v2101_v5  ;;  %v3086_v4 = vpop.f32.mrb[27].mxu1  ;;  %v2129_v13 = vrot.slane %v2121_v60, %v3890_v39  ;;  %v2136_v14 = vrot.slane %v2122_v31, %v3890_v39 }
 0x54c   : > { %v2197_v25 = vrot.slane %v2189_v7, %v3890_v39  ;;  %v2204_v19 = vrot.slane %v2190_v1, %v3890_v39 }
 0x568   : > { %v2054_v8 = vpop.f32.mrb[8].mxu0 }
 0x569   : > { %v2105_v38 = vcombine.low %v1966_v44, %v2054_v8  ;;  %v2106_v10 = vcombine.high %v1966_v44, %v2054_v8  ;;  %v3079_v11 = vpop.f32.mrb[9].mxu0 }
 0x56a   : > { %v2057_v16 = vpop.f32.mrb[10].mxu0  ;;  %v2423_v11 = vld [vmem:[#allocation7 + $0x68] sm:$0xff] }
 0x56b   : > { %v2113_v48 = vrot.slane %v2105_v38, %v3890_v39  ;;  %v2120_v18 = vrot.slane %v2106_v10, %v3890_v39  ;;  %v2173_v37 = vcombine.low %v1969_v51, %v2057_v16  ;;  %v2174_v62 = vcombine.high %v1969_v51, %v2057_v16  ;;  %v3080_v58 = vpop.f32.mrb[11].mxu0  ;;  %v2422_v10 = vld [vmem:[#allocation7 + $0x60] sm:$0xff] }
 0x56c   : > { %v2424_v58 = vld [vmem:[#allocation7 + $0x70] sm:$0xff] }
 0x56d   : > { %v2137_v9 = vcombine.low %v2113_v48, %v2129_v13  ;;  %v2138_v24 = vcombine.high %v2113_v48, %v2129_v13  ;;  %v2153_v53 = vcombine.low %v2120_v18, %v2136_v14  ;;  %v2154_v6 = vcombine.high %v2120_v18, %v2136_v14 }
 0x56e   : > { %v2181_v20 = vrot.slane %v2173_v37, %v3890_v39  ;;  %v2188_v21 = vrot.slane %v2174_v62, %v3890_v39 }
 0x56f   : > { %v2145_v22 = vrot.slane %v2137_v9, %v3893_v46  ;;  %v2152_v27 = vrot.slane %v2138_v24, %v3893_v46  ;;  %v2161_v28 = vrot.slane %v2153_v53, %v3893_v46  ;;  %v2168_v26 = vrot.slane %v2154_v6, %v3893_v46  ;;  %v2425_v9 = vld [vmem:[#allocation7 + $0x78] sm:$0xff] }
 0x570   : > { %v2205_v47 = vcombine.low %v2181_v20, %v2197_v25  ;;  %v2206_v12 = vcombine.high %v2181_v20, %v2197_v25  ;;  %v2221_v29 = vcombine.low %v2188_v21, %v2204_v19  ;;  %v2222_v0 = vcombine.high %v2188_v21, %v2204_v19 }
 0x571   : > { %v2241_v30 = vcombine.low %v2145_v22, %v2152_v27  ;;  %v2946_v17 = vcombine.high %v2145_v22, %v2152_v27  ;;  %v2257_v32 = vcombine.low %v2161_v28, %v2168_v26  ;;  %v2947_v33 = vcombine.high %v2161_v28, %v2168_v26 }
 0x572   : > { %v2213_v15 = vrot.slane %v2205_v47, %v3893_v46  ;;  %v2220_v23 = vrot.slane %v2206_v12, %v3893_v46  ;;  %v2229_v34 = vrot.slane %v2221_v29, %v3893_v46  ;;  %v2236_v35 = vrot.slane %v2222_v0, %v3893_v46 }
 0x573   : > { %v2248_v2 = vrot.slane %v2241_v30, %v3890_v39  ;;  %v2256_v40 = vrot.slane %v2946_v17, %v3890_v39  ;;  %v2264_v41 = vrot.slane %v2257_v32, %v3890_v39  ;;  %v2272_v42 = vrot.slane %v2947_v33, %v3890_v39 }
 0x574   : > { %v2309_v43 = vcombine.low %v2213_v15, %v2220_v23  ;;  %v2948_v36 = vcombine.high %v2213_v15, %v2220_v23  ;;  %v2325_v44 = vcombine.low %v2229_v34, %v2236_v35  ;;  %v2949_v45 = vcombine.high %v2229_v34, %v2236_v35 }
 0x575   : > { %v2274_v49 = vcombine.high %v2248_v2, %v2256_v40  ;;  %v2290_v50 = vcombine.high %v2264_v41, %v2272_v42  ;;  %v2273_v51 = vcombine.low %v2248_v2, %v2256_v40  ;;  %v2289_v52 = vcombine.low %v2264_v41, %v2272_v42  ;;  %v2950_v2 = vld [vmem:[%s4318_s5] ss:$0 sm:$0xff] }
 0x576   : > { %v2316_v55 = vrot.slane %v2309_v43, %v3890_v39  ;;  %v2324_v56 = vrot.slane %v2948_v36, %v3890_v39  ;;  %v2332_v57 = vrot.slane %v2325_v44, %v3890_v39  ;;  %v2340_v60 = vrot.slane %v2949_v45, %v3890_v39  ;;  %v3265_v45 = vld [vmem:[%s3805_s12] sm:$0xff] }
 0x577   : > { %v2288_v31 = vrot.slane %v2274_v49, %v3893_v46  ;;  %v2304_v61 = vrot.slane %v2290_v50, %v3893_v46  ;;  %v2281_v5 = vrot.slane %v2273_v51, %v3893_v46  ;;  %v2297_v7 = vrot.slane %v2289_v52, %v3893_v46  ;;  %v3266_v50 = vld [vmem:[%s3805_s12 + $0x8] sm:$0xff] }
 0x578   : > { %v2342_v1 = vcombine.high %v2316_v55, %v2324_v56  ;;  %v2358_v4 = vcombine.high %v2332_v57, %v2340_v60  ;;  %v2341_v8 = vcombine.low %v2316_v55, %v2324_v56  ;;  %v2357_v38 = vcombine.low %v2332_v57, %v2340_v60  ;;  %v2527_v52 = vld [vmem:[#allocation8 + $0x8] sm:$0xff]  ;;  %v2529_v55 = vld [vmem:[#allocation8 + $0x18] sm:$0xff]  ;;  %v2526_v56 = vld [vmem:[#allocation8] sm:$0xff] }
 0x579   : > { %v2307_v13 = vcombine.low %v2288_v31, %v2304_v61  ;;  %v2305_v14 = vcombine.low %v2281_v5, %v2297_v7  ;;  %v2306_v16 = vcombine.high %v2281_v5, %v2297_v7  ;;  %v2308_v48 = vcombine.high %v2288_v31, %v2304_v61  ;;  %v2528_v60 = vld [vmem:[#allocation8 + $0x10] sm:$0xff]  ;;  %v2531_v31 = vld [vmem:[#allocation8 + $0x28] sm:$0xff]  ;;  %v2533_v61 = vld [vmem:[#allocation8 + $0x38] sm:$0xff] }
 0x57a   : > { %v2356_v39 = vrot.slane %v2342_v1, %v3893_v46  ;;  %v2372_v18 = vrot.slane %v2358_v4, %v3893_v46  ;;  %v2349_v37 = vrot.slane %v2341_v8, %v3893_v46  ;;  %v2365_v62 = vrot.slane %v2357_v38, %v3893_v46  ;;  %v2530_v1 = vld [vmem:[#allocation8 + $0x20] sm:$0xff]  ;;  %v2532_v4 = vld [vmem:[#allocation8 + $0x30] sm:$0xff] }
 0x57b   : > { %v2432_v24 = vpack.c.bf16 %v2423_v11, %v2422_v10  ;;  %v2433_v20 = vpack.c.bf16 %v2425_v9, %v2424_v58  ;;  %v2559_v57 = vpack.c.bf16 %v2529_v55, %v2527_v52  ;;  %v2558_v5 = vpack.c.bf16 %v2528_v60, %v2526_v56  ;;  %v2534_v58 = vld [vmem:[#allocation8 + $0x40] sm:$0xff]  ;;  %v2536_v9 = vld [vmem:[#allocation8 + $0x50] sm:$0xff]  ;;  %v2654_v52 = vld [vmem:[#allocation10 + $0x98] sm:$0xff] }
 0x57c   : > { %v2375_v53 = vcombine.low %v2356_v39, %v2372_v18  ;;  %v2374_v6 = vcombine.high %v2349_v37, %v2365_v62  ;;  %v2373_v25 = vcombine.low %v2349_v37, %v2365_v62  ;;  %v2376_v19 = vcombine.high %v2356_v39, %v2372_v18  ;;  %v2535_v18 = vld [vmem:[#allocation8 + $0x48] sm:$0xff]  ;;  %v2537_v37 = vld [vmem:[#allocation8 + $0x58] sm:$0xff] }
 0x57d   : > { %3100 = vmatpush3.bf16.msra.mxu0 %v2432_v24  ;;  %v2561_v7 = vpack.c.bf16 %v2533_v61, %v2531_v31  ;;  %2586 = vmatprep.subr.bf16.mxu1 %v2559_v57  ;;  %v2560_v8 = vpack.c.bf16 %v2532_v4, %v2530_v1  ;;  %v2563_v62 = vpack.c.bf16 %v2537_v37, %v2535_v18  ;;  %v2637_v57 = vld [vmem:[#allocation10 + $0x10] sm:$0xff]  ;;  %v2638_v60 = vld [vmem:[#allocation10 + $0x18] sm:$0xff]  ;;  %v2655_v31 = vld [vmem:[#allocation10 + $0xa0] sm:$0xff] }
 0x57e   : > { %v3215_v21 = vpack.i.bf16 %v2375_v53, %v2307_v13  ;;  %v3210_v22 = vpack.i.bf16 %v2374_v6, %v2306_v16  ;;  %v3220_v27 = vpack.i.bf16 %v2376_v19, %v2308_v48  ;;  %3101 = vmatprep.subr.bf16.mxu0 %v3497_v54  ;;  %2587 = vmatpush1.bf16.msra.mxu1 %v2558_v5  ;;  %v2539_v53 = vld [vmem:[#allocation8 + $0x68] sm:$0xff]  ;;  %v2541_v6 = vld [vmem:[#allocation8 + $0x78] sm:$0xff]  ;;  %v2538_v19 = vld [vmem:[#allocation8 + $0x60] sm:$0xff] }
 0x57f   : > { %2588 = vmatprep.subr.bf16.mxu1 %v2561_v7  ;;  %v2562_v24 = vpack.c.bf16 %v2536_v9, %v2534_v58  ;;  %v2656_v5 = vld [vmem:[#allocation10 + $0xa8] sm:$0xff]  ;;  %v2668_v7 = vpack.c.bf16 %v2638_v60, %v2637_v57  ;;  %v2639_v4 = vld [vmem:[#allocation10 + $0x20] sm:$0xff] }
 0x580   : > { %3216 = vrot.lane.b32.xlu0 %v3215_v21, %s3499_s9  ;;  %3211 = vrot.lane.b32.xlu1 %v3210_v22, %s3500_s26  ;;  %v2543_v22 = vld [vmem:[#allocation8 + $0x88] sm:$0xff]  ;;  %v2677_v1 = vpack.c.bf16 %v2656_v5, %v2655_v31  ;;  %v2659_v18 = vld [vmem:[#allocation10 + $0xc0] sm:$0xff]  ;;  %s4359_s26 = sld [smem:[#allocation19_spill]] }
 0x581   : > { %3102 = vmatpush3.bf16.msra.mxu0 %v2433_v20  ;;  %v2540_v20 = vld [vmem:[#allocation8 + $0x70] sm:$0xff]  ;;  %v2660_v37 = vld [vmem:[#allocation10 + $0xc8] sm:$0xff]  ;;  %v2643_v9 = vld [vmem:[#allocation10 + $0x40] sm:$0xff] }
 0x582   : > { %2589 = vmatpush1.bf16.msra.mxu1 %v2560_v8  ;;  %v2564_v21 = vpack.c.bf16 %v2540_v20, %v2538_v19  ;;  %v2640_v8 = vld [vmem:[#allocation10 + $0x28] sm:$0xff]  ;;  %v2679_v58 = vpack.c.bf16 %v2660_v37, %v2659_v18 }
 0x583   : > { %2590 = vmatprep.subr.bf16.mxu1 %v2563_v62 }
 0x584   : > { %3221 = vrot.lane.b32.xlu1 %v3220_v27, %s3498_s11  ;;  %v2545_v27 = vld [vmem:[#allocation8 + $0x98] sm:$0xff]  ;;  %s554_s11 = scalar_lea.vmem [#allocation11], %s2920_s20  ;;  %s3504_s20 = smov [#allocation11]  }
 0x585   : > { %s2789_s9 = sshll.u32 %s554_s11, 4  ;;  %s3413_s27 = sshll.u32 %s3504_s20, 4  ;;  %s4269_s9 = int_to_ptr.vmem [resolvable:$true] %s2789_s9  ;;  %s3414_s27 = int_to_ptr.vmem [resolvable:$false] %s3413_s27 }
 0x586   : > { %2591 = vmatpush1.bf16.msra.mxu1 %v2562_v24  ;;  %v2644_v24 = vld [vmem:[#allocation10 + $0x48] sm:$0xff]  ;;  %s3409_s17 = scalar_lea.vmem %s4269_s9, 256  ;;  %p3416_p2 = scmp.lt.s32.totalorder %s4269_s9, %s3414_s27 }
 0x587   : > { %p3410_p5 = scmp.ne.s32.totalorder %s4269_s9, %s3409_s17 }
 0x589   : > { %p3411_p7 = pnand %p3410_p5, %p3744_p10 }
 0x58b   : > { %p3412_p12 = pneg %p3411_p7 }
 0x5f2   : > { %v3217_v46 = vpop.permute.xlu0 %3216  ;;  %v3212_v28 = vpop.permute.xlu1 %3211 }
 0x5f3   : > { %v3214_v26 = vunpack.i.h.bf16 %v3212_v28  ;;  %v3213_v47 = vunpack.i.l.bf16 %v3212_v28  ;;  %v3219_v12 = vunpack.i.h.bf16 %v3217_v46  ;;  %v3218_v29 = vunpack.i.l.bf16 %v3217_v46  ;;  %v2542_v28 = vld [vmem:[#allocation8 + $0x80] sm:$0xff] }
 0x5f4   : > { %v2567_v46 = vpack.c.bf16 %v2545_v27, %v2543_v22 }
 0x5f5   : > { %v2401_v0 = vsel %vm1623_vm1, %v2305_v14, %v3213_v47  ;;  %v2402_v30 = vsel %vm1623_vm1, %v2373_v25, %v3214_v26  ;;  %v2565_v25 = vpack.c.bf16 %v2541_v6, %v2539_v53  ;;  %v2544_v26 = vld [vmem:[#allocation8 + $0x90] sm:$0xff]  ;;  %v2547_v47 = vld [vmem:[#allocation8 + $0xa8] sm:$0xff]  ;;  %v2662_v6 = vld [vmem:[#allocation10 + $0xd8] sm:$0xff] }
 0x5f6   : > { %v3222_v54 = vpop.permute.xlu1 %3221  ;;  %v2404_v33 = vsel %vm2403_vm5, %v2401_v0, %v3218_v29  ;;  %v2405_v15 = vsel %vm2403_vm5, %v2402_v30, %v3219_v12  ;;  %v2566_v12 = vpack.c.bf16 %v2544_v26, %v2542_v28  ;;  %v2549_v29 = vld [vmem:[#allocation8 + $0xb8] sm:$0xff]  ;;  %v2546_v0 = vld [vmem:[#allocation8 + $0xa0] sm:$0xff]  ;;  %v2548_v30 = vld [vmem:[#allocation8 + $0xb0] sm:$0xff] }
 0x5f7   : > { %v3224_v17 = vunpack.i.h.bf16 %v3222_v54  ;;  %v3223_v32 = vunpack.i.l.bf16 %v3222_v54  ;;  %2592 = vmatprep.subr.bf16.mxu1 %v2565_v25  ;;  %v2569_v54 = vpack.c.bf16 %v2549_v29, %v2547_v47  ;;  %v2661_v53 = vld [vmem:[#allocation10 + $0xd0] sm:$0xff]  ;;  %v2671_v25 = vpack.c.bf16 %v2644_v24, %v2643_v9  ;;  %v2951_v47 = vld [vmem:[%s4319_s6] ss:$0 sm:$0xff] }
 0x5f8   : > { %2593 = vmatpush1.bf16.msra.mxu1 %v2564_v21  ;;  %v2680_v19 = vpack.c.bf16 %v2662_v6, %v2661_v53 }
 0x5f9   : > { %v2407_v23 = vsel %vm2406_vm6, %v2404_v33, %v3223_v32  ;;  %v2408_v34 = vsel %vm2406_vm6, %v2405_v15, %v3224_v17  ;;  %2594 = vmatprep.subr.bf16.mxu1 %v2567_v46  ;;  %v2551_v17 = vld [vmem:[#allocation8 + $0xc8] sm:$0xff]  ;;  %v2553_v32 = vld [vmem:[#allocation8 + $0xd8] sm:$0xff]  ;;  %v2568_v33 = vpack.c.bf16 %v2548_v30, %v2546_v0 }
 0x5fa   : > { %v2409_v35 = vpack.c.bf16 %v2408_v34, %v2407_v23  ;;  %v2571_v15 = vpack.c.bf16 %v2553_v32, %v2551_v17  ;;  %v2550_v23 = vld [vmem:[#allocation8 + $0xc0] sm:$0xff]  ;;  %v2552_v34 = vld [vmem:[#allocation8 + $0xd0] sm:$0xff] }
 0x5fc   : > { %3104 = vmatmul.mubr.bf16.vlgmr.msra.gmra.mrb[12].mxu0 %v2409_v35  ;;  %2595 = vmatpush1.bf16.msra.mxu1 %v2566_v12  ;;  %v2555_v35 = vld [vmem:[#allocation8 + $0xe8] sm:$0xff] }
 0x5fd   : > { %2596 = vmatprep.subr.bf16.mxu1 %v2569_v54  ;;  %v2952_v54 = vld [vmem:[%s4320_s7] ss:$0 sm:$0xff] }
 0x600   : > { %2597 = vmatpush1.bf16.msra.mxu1 %v2568_v33 }
 0x601   : > { %2598 = vmatprep.subr.bf16.mxu1 %v2571_v15 }
 0x6cf   : > { %v2475_v40 = vpop.f32.mrb[12].mxu0 }
 0x6d0   : > { %v2476_v41 = vadd.f32 %v2950_v2, %v2475_v40  ;;  %v3105_v42 = vpop.f32.mrb[13].mxu0  ;;  %v2570_v40 = vpack.c.bf16 %v2552_v34, %v2550_v23  ;;  %v2645_v23 = vld [vmem:[#allocation10 + $0x50] sm:$0xff]  ;;  %v2646_v34 = vld [vmem:[#allocation10 + $0x58] sm:$0xff] }
 0x6d1   : > { %v2478_v43 = vpop.f32.mrb[14].mxu0  ;;  %v2556_v42 = vld [vmem:[#allocation8 + $0xf0] sm:$0xff] }
 0x6d2   : > { %v2479_v36 = vadd.f32 %v2950_v2, %v2478_v43  ;;  %v3106_v44 = vpop.f32.mrb[15].mxu0  ;;  %v2482_v49 = vadd.f32 %v3265_v45, %v2476_v41  ;;  %v2557_v2 = vld [vmem:[#allocation8 + $0xf8] sm:$0xff]  ;;  %v2554_v41 = vld [vmem:[#allocation8 + $0xe0] sm:$0xff]  ;;  %2599 = vmatpush1.bf16.msra.mxu1 %v2570_v40  ;;  %v2664_v40 = vld [vmem:[#allocation10 + $0xe8] sm:$0xff] }
 0x6d3   : > { %v2573_v43 = vpack.c.bf16 %v2557_v2, %v2555_v35  ;;  %v2652_v44 = vld [vmem:[#allocation10 + $0x88] sm:$0xff]  ;;  %v2635_v45 = vld [vmem:[#allocation10] sm:$0xff]  ;;  %v2572_v61 = vpack.c.bf16 %v2556_v42, %v2554_v41  ;;  %v2672_v35 = vpack.c.bf16 %v2646_v34, %v2645_v23 }
 0x6d4   : > { %2484 = vadd.xlane.f32.xlu1 %v2482_v49  ;;  %v2483_v51 = vadd.f32 %v3266_v50, %v2479_v36  ;;  %v2651_v36 = vld [vmem:[#allocation10 + $0x80] sm:$0xff]  ;;  %v2636_v50 = vld [vmem:[#allocation10 + $0x8] sm:$0xff] }
 0x6d5   : > { %v2667_v55 = vpack.c.bf16 %v2636_v50, %v2635_v45  ;;  %2600 = vmatprep.subr.bf16.mxu1 %v2573_v43  ;;  %v2663_v2 = vld [vmem:[#allocation10 + $0xe0] sm:$0xff]  ;;  %v2648_v42 = vld [vmem:[#allocation10 + $0x68] sm:$0xff]  ;;  %v2666_v43 = vld [vmem:[#allocation10 + $0xf8] sm:$0xff] }
 0x6d6   : > { %2486 = vadd.xlane.f32.xlu0 %v2483_v51  ;;  %2601 = vmatpush1.bf16.msra.mxu1 %v2572_v61  ;;  %v2681_v41 = vpack.c.bf16 %v2664_v40, %v2663_v2  ;;  %v2649_v45 = vld [vmem:[#allocation10 + $0x70] sm:$0xff] }
 0x761   : > { %v2485_v38 = vpop.xlane.xlu1 %2484 }
 0x762   : > { %v2489_v10 = vmul.f32 0.0078125, %v2485_v38  ;;  %v2657_v38 = vld [vmem:[#allocation10 + $0xb0] sm:$0xff] }
 0x763   : > { %v2487_v11 = vpop.xlane.xlu0 %2486 }
 0x764   : > { %v4230_v13 = vsub.f32 %v2482_v49, %v2489_v10  ;;  %v2490_v14 = vmul.f32 0.0078125, %v2487_v11  ;;  %v2675_v49 = vpack.c.bf16 %v2652_v44, %v2651_v36  ;;  %v2658_v10 = vld [vmem:[#allocation10 + $0xb8] sm:$0xff]  ;;  %v2669_v11 = vpack.c.bf16 %v2640_v8, %v2639_v4 }
 0x766   : > { %v4232_v16 = vsub.f32 %v2483_v51, %v2490_v14  ;;  %v2493_v48 = vmul.f32 %v4230_v13, %v4230_v13  ;;  %v2653_v51 = vld [vmem:[#allocation10 + $0x90] sm:$0xff]  ;;  %2997 = vmatprep.subr.bf16.mxu0 %v2675_v49  ;;  %v2678_v14 = vpack.c.bf16 %v2658_v10, %v2657_v38  ;;  %v2650_v49 = vld [vmem:[#allocation10 + $0x78] sm:$0xff] }
 0x767   : > { %v2676_v56 = vpack.c.bf16 %v2654_v52, %v2653_v51  ;;  %2998 = vmatpush3.bf16.msra.mxu0 %v2667_v55  ;;  %v2674_v50 = vpack.c.bf16 %v2650_v49, %v2649_v45  ;;  %v2574_v51 = vld [vmem:[%s4359_s26] sm:$0x3] }
 0x768   : > { %2495 = vadd.xlane.f32.xlu0 %v2493_v48  ;;  %v2494_v39 = vmul.f32 %v4232_v16, %v4232_v16  ;;  %v2641_v48 = vld [vmem:[#allocation10 + $0x30] sm:$0xff]  ;;  %v2579_v52 = vrot.slane %v2574_v51, %v3832_v63  ;;  %v2583_v55 = vrot.slane %v2574_v51, %v642_v3 }
 0x769   : > { %2999 = vmatprep.subr.bf16.mxu0 %v2676_v56 }
 0x76a   : > { %2497 = vadd.xlane.f32.xlu1 %v2494_v39  ;;  %v2642_v39 = vld [vmem:[#allocation10 + $0x38] sm:$0xff] }
 0x76b   : > { %3000 = vmatpush3.bf16.msra.mxu0 %v2668_v7  ;;  %v2670_v62 = vpack.c.bf16 %v2642_v39, %v2641_v48 }
 0x76c   : > { %3001 = vmatprep.subr.bf16.mxu0 %v2677_v1 }
 0x76f   : > { %3002 = vmatpush3.bf16.msra.mxu0 %v2669_v11 }
 0x770   : > { %3003 = vmatprep.subr.bf16.mxu0 %v2678_v14 }
 0x773   : > { %3004 = vmatpush3.bf16.msra.mxu0 %v2670_v62 }
 0x774   : > { %3005 = vmatprep.subr.bf16.mxu0 %v2679_v58 }
 0x777   : > { %3006 = vmatpush3.bf16.msra.mxu0 %v2671_v25 }
 0x778   : > { %3007 = vmatprep.subr.bf16.mxu0 %v2680_v19 }
 0x77b   : > { %3008 = vmatpush3.bf16.msra.mxu0 %v2672_v35 }
 0x77c   : > { %3009 = vmatprep.subr.bf16.mxu0 %v2681_v41 }
 0x7f5   : > { %v2496_v20 = vpop.xlane.xlu0 %2495 }
 0x7f6   : > { %v2499_v21 = vmul.f32 0.0078125, %v2496_v20 }
 0x7f7   : > { %v2498_v22 = vpop.xlane.xlu1 %2497 }
 0x7f8   : > { %v2501_v27 = vadd.f32 1e-06, %v2499_v21  ;;  %v2500_v46 = vmul.f32 0.0078125, %v2498_v22 }
 0x7fa   : > { %3257 = vrsqrt.f32 %v2501_v27  ;;  %v2502_v28 = vadd.f32 1e-06, %v2500_v46 }
 0x7fc   : > { %3259 = vrsqrt.f32 %v2502_v28 }
 0x804   : > { %v3258_v26 = vpop.eup %3257 }
 0x805   : > { %v2505_v12 = vmul.f32 %v3258_v26, %v4230_v13  ;;  %v2647_v13 = vld [vmem:[#allocation10 + $0x60] sm:$0xff] }
 0x806   : > { %v3260_v29 = vpop.eup %3259  ;;  %v2673_v36 = vpack.c.bf16 %v2648_v42, %v2647_v13 }
 0x807   : > { %v2506_v0 = vmul.f32 %v3260_v29, %v4232_v16  ;;  %v2514_v30 = vmul.f32 %v2951_v47, %v2505_v12  ;;  %v2665_v16 = vld [vmem:[#allocation10 + $0xf0] sm:$0xff] }
 0x808   : > { %v2682_v44 = vpack.c.bf16 %v2666_v43, %v2665_v16  ;;  %3010 = vmatpush3.bf16.msra.mxu0 %v2673_v36 }
 0x809   : > { %v2515_v17 = vmul.f32 %v2951_v47, %v2506_v0  ;;  %v2523_v32 = vadd.f32 %v2952_v54, %v2514_v30  ;;  %v2954_v30 = vld [vmem:[%s4361_s23] ss:$0 sm:$0xff]  ;;  %s3415_s23 = scalar_lea.vmem %s3414_s27, 512 }
 0x80a   : > { %3011 = vmatprep.subr.bf16.mxu0 %v2682_v44  ;;  %p3417_p1 = scmp.lt.s32.totalorder %s3415_s23, %s3409_s17 }
 0x80b   : > { %v2524_v33 = vadd.f32 %v2952_v54, %v2515_v17 }
 0x80c   : > { %3012 = vmatpush3.bf16.msra.mxu0 %v2674_v50  ;;  %p3418_p13 = por %p3417_p1, %p3416_p2 }
 0x80d   : > { %v2525_v15 = vpack.c.bf16 %v2524_v33, %v2523_v32 }
 0x80e   : > { %p3419_p9 = pnand %p3418_p13, %p3412_p12 }
 0x80f   : > { %2619 = vmatmul.mubr.bf16.vlgmr.msra.gmra.mrb[28].mxu1 %v2525_v15 }
 0x8e2   : > { %v2620_v56 = vpop.f32.mrb[28].mxu1 }
 0x8e3   : > { %v2621_v57 = vadd.f32 %v2620_v56, %v2579_v52  ;;  %v2622_v60 = vpop.f32.mrb[29].mxu1 }
 0x8e4   : > { %v2623_v31 = vadd.f32 %v2622_v60, %v2583_v55  ;;  %v2624_v61 = vpop.f32.mrb[30].mxu1 }
 0x8e5   : > { %v2625_v5 = vadd.f32 %v2624_v61, %v2579_v52  ;;  %v2626_v7 = vpop.f32.mrb[31].mxu1  ;;  %v2629_v4 = vmax.f32 %v2621_v57, 0.0 }
 0x8e6   : > { %v2627_v1 = vadd.f32 %v2626_v7, %v2583_v55  ;;  %v2630_v38 = vmax.f32 %v2623_v31, 0.0 }
 0x8e7   : > { %v2631_v8 = vmax.f32 %v2625_v5, 0.0 }
 0x8e8   : > { %v2632_v10 = vmax.f32 %v2627_v1, 0.0 }
 0x8e9   : > { %v2633_v11 = vpack.c.bf16 %v2631_v8, %v2629_v4 }
 0x8ea   : > { %v2634_v14 = vpack.c.bf16 %v2632_v10, %v2630_v38 }
 0x8ec   : > { %2722 = vmatprep.mubr.bf16.mxu0 %v2634_v14 }
 0x8ed   : > { %2723 = vmatmul.mubr.bf16.vlgmr.msra.gmra.mrb[16].mxu0 %v2633_v11 }
 0x9c0   : > { %v3013_v63 = vpop.f32.mrb[16].mxu0 }
 0x9c1   : > { %v3014_v3 = vpop.f32.mrb[17].mxu0 }
 0x9c2   : > { %v3015_v48 = vadd.f32 %v3014_v3, %v3013_v63  ;;  %v3016_v39 = vpop.f32.mrb[18].mxu0 }
 0x9c3   : > { %v3017_v18 = vpop.f32.mrb[19].mxu0 }
 0x9c4   : > { %v2725_v37 = vadd.f32 %v3015_v48, %v2953_v59  ;;  %v3018_v62 = vadd.f32 %v3017_v18, %v3016_v39 }
 0x9c6   : > { %v2728_v58 = vadd.f32 %v3018_v62, %v2953_v59  ;;  %v2731_v9 = vadd.f32 %v2725_v37, %v2523_v32  ;;  %v2955_v32 = vld [vmem:[%s4362_s19] ss:$0 sm:$0xff] }
 0x9c8   : > { %2733 = vadd.xlane.f32.xlu0 %v2731_v9  ;;  %v2732_v24 = vadd.f32 %v2728_v58, %v2524_v33 }
 0x9ca   : > { %2735 = vadd.xlane.f32.xlu1 %v2732_v24 }
 0xa55   : > { %v2734_v53 = vpop.xlane.xlu0 %2733 }
 0xa56   : > { %v2737_v6 = vmul.f32 0.0078125, %v2734_v53 }
 0xa57   : > { %v2736_v25 = vpop.xlane.xlu1 %2735 }
 0xa58   : > { %v2739_v19 = vsub.f32 %v2731_v9, %v2737_v6  ;;  %v2738_v20 = vmul.f32 0.0078125, %v2736_v25 }
 0xa5a   : > { %v2740_v21 = vsub.f32 %v2732_v24, %v2738_v20  ;;  %v2741_v22 = vmul.f32 %v2739_v19, %v2739_v19 }
 0xa5c   : > { %2743 = vadd.xlane.f32.xlu0 %v2741_v22  ;;  %v2742_v27 = vmul.f32 %v2740_v21, %v2740_v21 }
 0xa5e   : > { %2745 = vadd.xlane.f32.xlu1 %v2742_v27 }
 0xae9   : > { %v2744_v46 = vpop.xlane.xlu0 %2743 }
 0xaea   : > { %v2747_v28 = vmul.f32 0.0078125, %v2744_v46 }
 0xaeb   : > { %v2746_v26 = vpop.xlane.xlu1 %2745 }
 0xaec   : > { %v2749_v47 = vadd.f32 1e-06, %v2747_v28  ;;  %v2748_v12 = vmul.f32 0.0078125, %v2746_v26 }
 0xaee   : > { %3261 = vrsqrt.f32 %v2749_v47  ;;  %v2750_v29 = vadd.f32 1e-06, %v2748_v12 }
 0xaf0   : > { %3263 = vrsqrt.f32 %v2750_v29 }
 0xaf8   : > { %v3262_v0 = vpop.eup %3261 }
 0xaf9   : > { %v2753_v54 = vmul.f32 %v3262_v0, %v2739_v19 }
 0xafa   : > { %v3264_v17 = vpop.eup %3263 }
 0xafb   : > { %v2762_v33 = vmul.f32 %v2954_v30, %v2753_v54  ;;  %v2754_v15 = vmul.f32 %v3264_v17, %v2740_v21 }
 0xafd   : > { %v2771_v23 = vadd.f32 %v2955_v32, %v2762_v33  ;;  %v2763_v34 = vmul.f32 %v2954_v30, %v2754_v15 }
 0xaff   : > { %v2772_v35 = vadd.f32 %v2955_v32, %v2763_v34  ;;  %2773 = vst [vmem:[%s554_s11] sm:$0xff] %v2771_v23 }
 0xb01   : > { %2774 = vst [vmem:[%s554_s11 + $0x8] sm:$0xff] %v2772_v35 }
 0xb02   : > { %3422 = shalt.err (!%p3419_p9)
}
 0xb03   : > { %s3423_s14 = scalar_lea.hbm %s4267_s22, 256  ;;  %s3427_s21 = scalar_lea.hbm %s4363_s24, 512 }
 0xb04   : > { %p3424_p0 = scmp.ne.s32.totalorder %s4267_s22, %s3423_s14  ;;  %p3428_p8 = scmp.lt.u32.totalorder %s4267_s22, %s4363_s24 }
 0xb05   : > { %p3429_p6 = scmp.lt.u32.totalorder %s3427_s21, %s3423_s14  ;;  %p3431_p5 = scmp.lt.u32.totalorder %s3423_s14, %s4267_s22 }
 0xb06   : > { %p3425_p11 = pnand %p3424_p0, %p3744_p10 }
 0xb07   : > { %p3430_p3 = por %p3429_p6, %p3428_p8 }
 0xb08   : > { %p3426_p4 = pneg %p3425_p11 }
 0xb09   : > { %p3432_p7 = por %p3431_p5, %p3430_p3 }
 0xb0b   : > { %p3433_p12 = pnand %p3432_p7, %p3426_p4 }
 0xb0d   : > { %3436 = shalt.err (!%p3433_p12)
}
 0xb0e   : > { %s3505_s2 = smov 128   ;;  %s3506_s17 = smov 8  }
 0xb0f   : > { %3125 = dma.vmem_to_hbm [thread:$0]  (%p3744_p10), %s4269_s9, 256, %s4267_s22, %s2776_s25, %s3505_s2, %s3505_s2, %s3506_s17  }
 0xb10 PF: > { %s4364_s20 = sld [smem:[#allocation16_spill]]  ;;  %s4365_s27 = sld [smem:[#allocation17_spill]] }
 0xb11   : > { %p4367_p1 = scmp.ge.s32.totalorder %s3483_s16, 2 }
 0xb16   : > { %s2804_s23 = sand.u32 1, %s4364_s20   ;;  %p4366_p2 = scmp.ne.s32.totalorder %s4365_s27, 0 }
 0xb17   : > { %s2805_s14 = scalar_lea.sflag [#allocation4], %s2804_s23 }
 0xb18   : > { %p3145_p13 = pnand %p4367_p1, %p4366_p2 }
 0xb1a   : > { %3466 = dma.done.wait (!%p3145_p13), %s2805_s14, 256  }
 0xb1b   : > { %3468 = vsyncadd (!%p3145_p13), %s2805_s14, 4294967040  ;;  %s4368_s12 = smov %s3734_s29  ;;  %p29_p9 = scmp.ge.s32.totalorder %s3734_s29, 4  }
 0xb1c   : > { %s4369_s29 = smov %s3475_s30  ;;  %s4370_s30 = smov %s3479_s15 }
 0xb1d   : > { %s4371_s15 = smov %s3750_s18  ;;  %s4372_s16 = smov %s4368_s12 }
 0xb1e   :  { %31 = sbr.rel (!%p29_p9) target bundleno = 14 (0xe), region = 140 }
 0xb25   :  { %2810 = vsyncpa [#allocation3], 1 }
 0xb26   :  { %2812 = vsyncpa [#allocation3 + $0x1], 1 }
 0xb27   :  { %2813 = vsyncpa [#allocation6], 1 }
 0xb28   :  { %2814 = vsyncpa [#allocation9], 1 }
 0xb29   :  { %2815 = vsyncpa [#allocation4], 1 }
 0xb2a   :  { %2817 = vsyncpa [#allocation4 + $0x1], 1 }

</bundles_post_ra>
